<compile_context>
chip_gen: v5e
topology: v5e:2x2
jax: 0.10.0
libtpu: 0.0.40
codegen_flags: <defaults>
</compile_context>

<pallas_src>
import numpy as np
import jax
import jax.numpy as jnp
from jax.experimental import pallas as pl
from jax.experimental.pallas import tpu as pltpu

# ----------------------------- config (small) -------------------------------
B = 2            # batch
L = 8            # maxlen / sequence length
H = 32           # hidden_units
NH = 2           # num_heads
HD = H // NH     # head dim
NUM_BLOCKS = 2
ITEM_NUM = 50
PAD_TOKEN = ITEM_NUM
EPS = 1e-8
N = B * L        # flattened rows
NV = 10          # bias / LayerNorm vectors packed per block


def _layernorm(x, w, b):
    mu = jnp.mean(x, axis=-1, keepdims=True)
    var = jnp.mean((x - mu) ** 2, axis=-1, keepdims=True)
    return (x - mu) / jnp.sqrt(var + EPS) * w + b


# additive attention bias: allow (same batch element) AND (key pos <= query pos)
def _make_attn_bias():
    idx = np.arange(N)
    same_batch = (idx[:, None] // L) == (idx[None, :] // L)
    causal = idx[None, :] <= idx[:, None]
    return jnp.asarray(np.where(same_batch & causal, 0.0, -1e30),
                       dtype=jnp.float32)


ATTN_BIAS = _make_attn_bias()     # (N, N) f32 constant


# --------------------------- fused forward kernel ----------------------------
def sasrec_fused_kernel(x_ref, keep_ref, bias_ref, wslab_ref, vslab_ref,
                        lastln_ref, pn_ref, out_ref, qh_s, kh_s, vh_s):
    x = x_ref[...]                    # (N, H)  flattened (B*L, H) activations
    keep = keep_ref[...]              # (N, H)  lane-dense timeline mask
    attn_bias = bias_ref[...]         # (N, N)  additive causal+block mask
    scale = 1.0 / (float(HD) ** 0.5)

    for blk in range(NUM_BLOCKS):     # static unroll over transformer blocks
        # ---- packed per-block parameters (pre-transposed in the wrapper) ----
        w_q = wslab_ref[blk, 0 * H:1 * H, :]     # (H, H)  so q = x @ w_q
        w_k = wslab_ref[blk, 1 * H:2 * H, :]
        w_v = wslab_ref[blk, 2 * H:3 * H, :]
        # rows [3H:4H] hold out_proj^T; sliced per head below
        w_f1 = wslab_ref[blk, 4 * H:5 * H, :]
        w_f2 = wslab_ref[blk, 5 * H:6 * H, :]

        ln1_w = vslab_ref[blk, 0:1, :]
        ln1_b = vslab_ref[blk, 1:2, :]
        b_q = vslab_ref[blk, 2:3, :]
        b_k = vslab_ref[blk, 3:4, :]
        b_v = vslab_ref[blk, 4:5, :]
        b_o = vslab_ref[blk, 5:6, :]
        ln2_w = vslab_ref[blk, 6:7, :]
        ln2_b = vslab_ref[blk, 7:8, :]
        b_f1 = vslab_ref[blk, 8:9, :]
        b_f2 = vslab_ref[blk, 9:10, :]

        # ---- pre-attention LayerNorm (applied to Q only, like the torch code)
        q_in = _layernorm(x, ln1_w, ln1_b)                       # (N, H)

        # ---- Q/K/V projections on the flattened (B*L, H) slab ----
        q = jnp.dot(q_in, w_q, preferred_element_type=jnp.float32) + b_q
        k = jnp.dot(x, w_k, preferred_element_type=jnp.float32) + b_k
        v = jnp.dot(x, w_v, preferred_element_type=jnp.float32) + b_v

        # head-major copies in VMEM scratch -> batched 3-D attention einsums
        for h in range(NH):
            qh_s[h] = q[:, h * HD:(h + 1) * HD]
            kh_s[h] = k[:, h * HD:(h + 1) * HD]
            vh_s[h] = v[:, h * HD:(h + 1) * HD]

        s = jnp.einsum('hqd,hkd->hqk', qh_s[...], kh_s[...],
                       preferred_element_type=jnp.float32) * scale
        s = s + attn_bias[None, :, :]                            # (NH, N, N)
        s = s - jnp.max(s, axis=-1, keepdims=True)
        p = jnp.exp(s)
        p = p / jnp.sum(p, axis=-1, keepdims=True)               # softmax, f32
        o = jnp.einsum('hqk,hkd->hqd', p, vh_s[...],
                       preferred_element_type=jnp.float32)       # (NH, N, HD)

        # output projection without a lane concat: sum per-head row blocks of
        # out_proj^T (rows [3H + h*HD : 3H + (h+1)*HD] of the weight slab)
        mha = b_o
        for h in range(NH):
            w_o_h = wslab_ref[blk, 3 * H + h * HD:3 * H + (h + 1) * HD, :]
            mha = mha + jnp.dot(o[h], w_o_h,
                                preferred_element_type=jnp.float32)

        # residual on the *normalized* Q, as in the torch reference
        s1 = q_in + mha

        # ---- pointwise feed-forward (Conv1d kernel_size=1 == matmul over H)
        h2 = _layernorm(s1, ln2_w, ln2_b)
        y = jnp.dot(h2, w_f1, preferred_element_type=jnp.float32) + b_f1
        y = jnp.maximum(y, 0.0)                                  # ReLU
        y = jnp.dot(y, w_f2, preferred_element_type=jnp.float32) + b_f2
        y = y + h2                                               # PFF residual

        # timeline mask (lane-dense)
        x = y * keep

    # ---- final LayerNorm + pos/neg logits, fused into the same kernel ----
    feats = _layernorm(x, lastln_ref[0:1, :], lastln_ref[1:2, :])    # (N, H)
    out_ref[...] = jnp.sum(feats[None, :, :] * pn_ref[...], axis=-1)  # (2, N)


# ------------------------------ parameters -----------------------------------
def xavier_uniform(key, shape):
    fan_out, fan_in = shape[0], shape[1]
    bound = (6.0 / (fan_in + fan_out)) ** 0.5
    return jax.random.uniform(key, shape, jnp.float32, -bound, bound)


def init_params(key):
    keys = iter(jax.random.split(key, 64))
    params = {
        "item_emb": xavier_uniform(next(keys), (ITEM_NUM + 1, H)),
        "pos_emb": xavier_uniform(next(keys), (L, H)),
        "last_ln_w": jnp.ones((1, H), jnp.float32),
        "last_ln_b": jnp.zeros((1, H), jnp.float32),
        "blocks": [],
    }
    for _ in range(NUM_BLOCKS):
        blk = {
            "ln1_w": jnp.ones((1, H), jnp.float32),
            "ln1_b": jnp.zeros((1, H), jnp.float32),
            "in_w": xavier_uniform(next(keys), (3 * H, H)),   # MHA in_proj
            "in_b": jnp.zeros((1, 3 * H), jnp.float32),
            "out_w": xavier_uniform(next(keys), (H, H)),      # MHA out_proj
            "out_b": jnp.zeros((1, H), jnp.float32),
            "ln2_w": jnp.ones((1, H), jnp.float32),
            "ln2_b": jnp.zeros((1, H), jnp.float32),
            "w1": xavier_uniform(next(keys), (H, H)),         # Conv1d(H,H,1)
            "b1": jnp.zeros((1, H), jnp.float32),
            "w2": xavier_uniform(next(keys), (H, H)),
            "b2": jnp.zeros((1, H), jnp.float32),
        }
        params["blocks"].append(blk)
    return params


def pack_params(params):
    """Pre-transpose and pack per-block params into contiguous slabs (wrapper-side)."""
    w_slabs, v_slabs = [], []
    for blk in params["blocks"]:
        in_w = blk["in_w"]                       # (3H, H) torch layout
        w_slab = jnp.concatenate([
            in_w[0:H, :].T, in_w[H:2 * H, :].T, in_w[2 * H:3 * H, :].T,
            blk["out_w"].T, blk["w1"].T, blk["w2"].T], axis=0)     # (6H, H)
        in_b = blk["in_b"]                       # (1, 3H)
        v_slab = jnp.concatenate([
            blk["ln1_w"], blk["ln1_b"],
            in_b[:, 0:H], in_b[:, H:2 * H], in_b[:, 2 * H:3 * H],
            blk["out_b"], blk["ln2_w"], blk["ln2_b"],
            blk["b1"], blk["b2"]], axis=0)                          # (NV, H)
        w_slabs.append(w_slab)
        v_slabs.append(v_slab)
    return {
        "item_emb": params["item_emb"],
        "pos_emb": params["pos_emb"],
        "w_slabs": jnp.stack(w_slabs, axis=0),                     # (NB, 6H, H)
        "v_slabs": jnp.stack(v_slabs, axis=0),                     # (NB, NV, H)
        "last_ln": jnp.concatenate(
            [params["last_ln_w"], params["last_ln_b"]], axis=0),   # (2, H)
    }


# ------------------------------- forward --------------------------------------
@jax.jit
def sasrec_forward(packed, log_seqs, pos_seqs, neg_seqs):
    # embedding lookups + positional add + timeline mask (glue, plain JAX)
    seqs = packed["item_emb"][log_seqs] * (float(H) ** 0.5)
    seqs = seqs + packed["pos_emb"][None, :, :]
    keep = (log_seqs != PAD_TOKEN).astype(jnp.float32)[:, :, None]   # (B, L, 1)
    x0 = (seqs * keep).reshape(N, H)
    keep_flat = jnp.broadcast_to(keep, (B, L, H)).reshape(N, H)      # lane-dense

    pn_embs = jnp.stack([packed["item_emb"][pos_seqs],
                         packed["item_emb"][neg_seqs]],
                        axis=0).reshape(2, N, H)

    out = pl.pallas_call(
        sasrec_fused_kernel,
        out_shape=jax.ShapeDtypeStruct((2, N), jnp.float32),
        scratch_shapes=[
            pltpu.VMEM((NH, N, HD), jnp.float32),   # head-major Q
            pltpu.VMEM((NH, N, HD), jnp.float32),   # head-major K
            pltpu.VMEM((NH, N, HD), jnp.float32),   # head-major V
        ],
    )(x0, keep_flat, ATTN_BIAS, packed["w_slabs"], packed["v_slabs"],
      packed["last_ln"], pn_embs)

    pos_logits = out[0].reshape(B, L)
    neg_logits = out[1].reshape(B, L)
    return pos_logits, neg_logits


# --------------------------------- main ---------------------------------------
if __name__ == "__main__":
    root = jax.random.PRNGKey(0)
    k_param, k_log, k_pos, k_neg = jax.random.split(root, 4)

    params = init_params(k_param)
    packed = pack_params(params)

    log_seqs = jax.random.randint(k_log, (B, L), 0, ITEM_NUM, dtype=jnp.int32)
    # make the first two positions of batch element 0 padding, like real data
    log_seqs = log_seqs.at[0, :2].set(PAD_TOKEN)
    pos_seqs = jax.random.randint(k_pos, (B, L), 0, ITEM_NUM, dtype=jnp.int32)
    neg_seqs = jax.random.randint(k_neg, (B, L), 0, ITEM_NUM, dtype=jnp.int32)

    pos_logits, neg_logits = sasrec_forward(packed, log_seqs, pos_seqs, neg_seqs)
    jax.block_until_ready((pos_logits, neg_logits))

    assert pos_logits.shape == (B, L) and neg_logits.shape == (B, L)
    assert bool(jnp.all(jnp.isfinite(pos_logits))) and bool(jnp.all(jnp.isfinite(neg_logits)))
    print("KERNEL_OK")
</pallas_src>

<mosaic_0001>
module attributes {stable_mosaic.version = 11 : i64} {
  func.func @sasrec_fused_kernel(%arg0: memref<16x32xf32, #tpu.memory_space<vmem>>, %arg1: memref<16x32xf32, #tpu.memory_space<vmem>>, %arg2: memref<16x16xf32, #tpu.memory_space<vmem>>, %arg3: memref<2x192x32xf32, #tpu.memory_space<vmem>>, %arg4: memref<2x10x32xf32, #tpu.memory_space<vmem>>, %arg5: memref<2x32xf32, #tpu.memory_space<vmem>>, %arg6: memref<2x16x32xf32, #tpu.memory_space<vmem>>, %arg7: memref<2x16xf32, #tpu.memory_space<vmem>>, %arg8: memref<2x16x16xf32, #tpu.memory_space<vmem>>, %arg9: memref<2x16x16xf32, #tpu.memory_space<vmem>>, %arg10: memref<2x16x16xf32, #tpu.memory_space<vmem>>) attributes {dimension_semantics = [], scalar_prefetch = 0 : i64, scratch_operands = 3 : i64, tpu.core_type = #tpu.core_type<tc>} {
    %c0 = arith.constant 0 : index
    %c0_0 = arith.constant 0 : index
    %0 = vector.load %arg0[%c0, %c0_0] : memref<16x32xf32, #tpu.memory_space<vmem>>, vector<16x32xf32>
    %c0_1 = arith.constant 0 : index
    %c0_2 = arith.constant 0 : index
    %1 = vector.load %arg1[%c0_1, %c0_2] : memref<16x32xf32, #tpu.memory_space<vmem>>, vector<16x32xf32>
    %c0_3 = arith.constant 0 : index
    %c0_4 = arith.constant 0 : index
    %2 = vector.load %arg2[%c0_3, %c0_4] : memref<16x16xf32, #tpu.memory_space<vmem>>, vector<16x16xf32>
    %c0_5 = arith.constant 0 : index
    %c0_6 = arith.constant 0 : index
    %c0_7 = arith.constant 0 : index
    %3 = vector.load %arg3[%c0_5, %c0_6, %c0_7] : memref<2x192x32xf32, #tpu.memory_space<vmem>>, vector<1x32x32xf32>
    %4 = vector.shape_cast %3 : vector<1x32x32xf32> to vector<32x32xf32>
    %c0_8 = arith.constant 0 : index
    %c32 = arith.constant 32 : index
    %c0_9 = arith.constant 0 : index
    %5 = vector.load %arg3[%c0_8, %c32, %c0_9] : memref<2x192x32xf32, #tpu.memory_space<vmem>>, vector<1x32x32xf32>
    %6 = vector.shape_cast %5 : vector<1x32x32xf32> to vector<32x32xf32>
    %c0_10 = arith.constant 0 : index
    %c64 = arith.constant 64 : index
    %c0_11 = arith.constant 0 : index
    %7 = vector.load %arg3[%c0_10, %c64, %c0_11] : memref<2x192x32xf32, #tpu.memory_space<vmem>>, vector<1x32x32xf32>
    %8 = vector.shape_cast %7 : vector<1x32x32xf32> to vector<32x32xf32>
    %c0_12 = arith.constant 0 : index
    %c128 = arith.constant 128 : index
    %c0_13 = arith.constant 0 : index
    %9 = vector.load %arg3[%c0_12, %c128, %c0_13] : memref<2x192x32xf32, #tpu.memory_space<vmem>>, vector<1x32x32xf32>
    %10 = vector.shape_cast %9 : vector<1x32x32xf32> to vector<32x32xf32>
    %c0_14 = arith.constant 0 : index
    %c160 = arith.constant 160 : index
    %c0_15 = arith.constant 0 : index
    %11 = vector.load %arg3[%c0_14, %c160, %c0_15] : memref<2x192x32xf32, #tpu.memory_space<vmem>>, vector<1x32x32xf32>
    %12 = vector.shape_cast %11 : vector<1x32x32xf32> to vector<32x32xf32>
    %c0_16 = arith.constant 0 : index
    %c0_17 = arith.constant 0 : index
    %c0_18 = arith.constant 0 : index
    %13 = vector.load %arg4[%c0_16, %c0_17, %c0_18] : memref<2x10x32xf32, #tpu.memory_space<vmem>>, vector<1x1x32xf32>
    %14 = vector.shape_cast %13 : vector<1x1x32xf32> to vector<1x32xf32>
    %c0_19 = arith.constant 0 : index
    %c1 = arith.constant 1 : index
    %c0_20 = arith.constant 0 : index
    %15 = vector.load %arg4[%c0_19, %c1, %c0_20] : memref<2x10x32xf32, #tpu.memory_space<vmem>>, vector<1x1x32xf32>
    %16 = vector.shape_cast %15 : vector<1x1x32xf32> to vector<1x32xf32>
    %c0_21 = arith.constant 0 : index
    %c2 = arith.constant 2 : index
    %c0_22 = arith.constant 0 : index
    %17 = vector.load %arg4[%c0_21, %c2, %c0_22] : memref<2x10x32xf32, #tpu.memory_space<vmem>>, vector<1x1x32xf32>
    %18 = vector.shape_cast %17 : vector<1x1x32xf32> to vector<1x32xf32>
    %c0_23 = arith.constant 0 : index
    %c3 = arith.constant 3 : index
    %c0_24 = arith.constant 0 : index
    %19 = vector.load %arg4[%c0_23, %c3, %c0_24] : memref<2x10x32xf32, #tpu.memory_space<vmem>>, vector<1x1x32xf32>
    %20 = vector.shape_cast %19 : vector<1x1x32xf32> to vector<1x32xf32>
    %c0_25 = arith.constant 0 : index
    %c4 = arith.constant 4 : index
    %c0_26 = arith.constant 0 : index
    %21 = vector.load %arg4[%c0_25, %c4, %c0_26] : memref<2x10x32xf32, #tpu.memory_space<vmem>>, vector<1x1x32xf32>
    %22 = vector.shape_cast %21 : vector<1x1x32xf32> to vector<1x32xf32>
    %c0_27 = arith.constant 0 : index
    %c5 = arith.constant 5 : index
    %c0_28 = arith.constant 0 : index
    %23 = vector.load %arg4[%c0_27, %c5, %c0_28] : memref<2x10x32xf32, #tpu.memory_space<vmem>>, vector<1x1x32xf32>
    %24 = vector.shape_cast %23 : vector<1x1x32xf32> to vector<1x32xf32>
    %c0_29 = arith.constant 0 : index
    %c6 = arith.constant 6 : index
    %c0_30 = arith.constant 0 : index
    %25 = vector.load %arg4[%c0_29, %c6, %c0_30] : memref<2x10x32xf32, #tpu.memory_space<vmem>>, vector<1x1x32xf32>
    %26 = vector.shape_cast %25 : vector<1x1x32xf32> to vector<1x32xf32>
    %c0_31 = arith.constant 0 : index
    %c7 = arith.constant 7 : index
    %c0_32 = arith.constant 0 : index
    %27 = vector.load %arg4[%c0_31, %c7, %c0_32] : memref<2x10x32xf32, #tpu.memory_space<vmem>>, vector<1x1x32xf32>
    %28 = vector.shape_cast %27 : vector<1x1x32xf32> to vector<1x32xf32>
    %c0_33 = arith.constant 0 : index
    %c8 = arith.constant 8 : index
    %c0_34 = arith.constant 0 : index
    %29 = vector.load %arg4[%c0_33, %c8, %c0_34] : memref<2x10x32xf32, #tpu.memory_space<vmem>>, vector<1x1x32xf32>
    %30 = vector.shape_cast %29 : vector<1x1x32xf32> to vector<1x32xf32>
    %c0_35 = arith.constant 0 : index
    %c9 = arith.constant 9 : index
    %c0_36 = arith.constant 0 : index
    %31 = vector.load %arg4[%c0_35, %c9, %c0_36] : memref<2x10x32xf32, #tpu.memory_space<vmem>>, vector<1x1x32xf32>
    %32 = vector.shape_cast %31 : vector<1x1x32xf32> to vector<1x32xf32>
    %cst = arith.constant dense<0.000000e+00> : vector<16xf32>
    %33 = vector.multi_reduction <add>, %0, %cst [1] : vector<16x32xf32> to vector<16xf32>
    %34 = vector.shape_cast %33 : vector<16xf32> to vector<16x1xf32>
    %cst_37 = arith.constant 3.200000e+01 : f32
    %35 = vector.broadcast %cst_37 : f32 to vector<16x1xf32>
    %36 = arith.divf %34, %35 : vector<16x1xf32>
    %37 = vector.broadcast %36 : vector<16x1xf32> to vector<16x32xf32>
    %38 = arith.subf %0, %37 : vector<16x32xf32>
    %39 = arith.mulf %38, %38 : vector<16x32xf32>
    %cst_38 = arith.constant dense<0.000000e+00> : vector<16xf32>
    %40 = vector.multi_reduction <add>, %39, %cst_38 [1] : vector<16x32xf32> to vector<16xf32>
    %41 = vector.shape_cast %40 : vector<16xf32> to vector<16x1xf32>
    %cst_39 = arith.constant 3.200000e+01 : f32
    %42 = vector.broadcast %cst_39 : f32 to vector<16x1xf32>
    %43 = arith.divf %41, %42 : vector<16x1xf32>
    %44 = vector.broadcast %36 : vector<16x1xf32> to vector<16x32xf32>
    %45 = arith.subf %0, %44 : vector<16x32xf32>
    %cst_40 = arith.constant 9.99999993E-9 : f32
    %46 = vector.broadcast %cst_40 : f32 to vector<16x1xf32>
    %47 = arith.addf %43, %46 : vector<16x1xf32>
    %48 = math.sqrt %47 : vector<16x1xf32>
    %49 = vector.broadcast %48 : vector<16x1xf32> to vector<16x32xf32>
    %50 = arith.divf %45, %49 : vector<16x32xf32>
    %51 = vector.broadcast %14 : vector<1x32xf32> to vector<16x32xf32>
    %52 = arith.mulf %50, %51 : vector<16x32xf32>
    %53 = vector.broadcast %16 : vector<1x32xf32> to vector<16x32xf32>
    %54 = arith.addf %52, %53 : vector<16x32xf32>
    %cst_41 = arith.constant dense<0.000000e+00> : vector<16x32xf32>
    %55 = tpu.matmul %54, %4, %cst_41 {dimension_numbers = #tpu.dot_dimension_numbers<[1], [0], [0], [1], [0, 0, 1, 1], [], []>} : vector<16x32xf32>, vector<32x32xf32>, vector<16x32xf32> -> vector<16x32xf32>
    %56 = vector.broadcast %18 : vector<1x32xf32> to vector<16x32xf32>
    %57 = arith.addf %55, %56 : vector<16x32xf32>
    %cst_42 = arith.constant dense<0.000000e+00> : vector<16x32xf32>
    %58 = tpu.matmul %0, %6, %cst_42 {dimension_numbers = #tpu.dot_dimension_numbers<[1], [0], [0], [1], [0, 0, 1, 1], [], []>} : vector<16x32xf32>, vector<32x32xf32>, vector<16x32xf32> -> vector<16x32xf32>
    %59 = vector.broadcast %20 : vector<1x32xf32> to vector<16x32xf32>
    %60 = arith.addf %58, %59 : vector<16x32xf32>
    %cst_43 = arith.constant dense<0.000000e+00> : vector<16x32xf32>
    %61 = tpu.matmul %0, %8, %cst_43 {dimension_numbers = #tpu.dot_dimension_numbers<[1], [0], [0], [1], [0, 0, 1, 1], [], []>} : vector<16x32xf32>, vector<32x32xf32>, vector<16x32xf32> -> vector<16x32xf32>
    %62 = vector.broadcast %22 : vector<1x32xf32> to vector<16x32xf32>
    %63 = arith.addf %61, %62 : vector<16x32xf32>
    %64 = vector.extract_strided_slice %57 {offsets = [0, 0], sizes = [16, 16], strides = [1, 1]} : vector<16x32xf32> to vector<16x16xf32>
    %c0_44 = arith.constant 0 : index
    %c0_45 = arith.constant 0 : index
    %c0_46 = arith.constant 0 : index
    %65 = vector.load %arg8[%c0_44, %c0_45, %c0_46] : memref<2x16x16xf32, #tpu.memory_space<vmem>>, vector<1x16x16xf32>
    %66 = vector.shape_cast %65 : vector<1x16x16xf32> to vector<16x16xf32>
    %67 = vector.shape_cast %64 : vector<16x16xf32> to vector<1x16x16xf32>
    tpu.vector_store %arg8[%c0_44, %c0_45, %c0_46], %67 {strides = array<i32>} : memref<2x16x16xf32, #tpu.memory_space<vmem>>, vector<1x16x16xf32>,
    %68 = vector.extract_strided_slice %60 {offsets = [0, 0], sizes = [16, 16], strides = [1, 1]} : vector<16x32xf32> to vector<16x16xf32>
    %c0_47 = arith.constant 0 : index
    %c0_48 = arith.constant 0 : index
    %c0_49 = arith.constant 0 : index
    %69 = vector.load %arg9[%c0_47, %c0_48, %c0_49] : memref<2x16x16xf32, #tpu.memory_space<vmem>>, vector<1x16x16xf32>
    %70 = vector.shape_cast %69 : vector<1x16x16xf32> to vector<16x16xf32>
    %71 = vector.shape_cast %68 : vector<16x16xf32> to vector<1x16x16xf32>
    tpu.vector_store %arg9[%c0_47, %c0_48, %c0_49], %71 {strides = array<i32>} : memref<2x16x16xf32, #tpu.memory_space<vmem>>, vector<1x16x16xf32>,
    %72 = vector.extract_strided_slice %63 {offsets = [0, 0], sizes = [16, 16], strides = [1, 1]} : vector<16x32xf32> to vector<16x16xf32>
    %c0_50 = arith.constant 0 : index
    %c0_51 = arith.constant 0 : index
    %c0_52 = arith.constant 0 : index
    %73 = vector.load %arg10[%c0_50, %c0_51, %c0_52] : memref<2x16x16xf32, #tpu.memory_space<vmem>>, vector<1x16x16xf32>
    %74 = vector.shape_cast %73 : vector<1x16x16xf32> to vector<16x16xf32>
    %75 = vector.shape_cast %72 : vector<16x16xf32> to vector<1x16x16xf32>
    tpu.vector_store %arg10[%c0_50, %c0_51, %c0_52], %75 {strides = array<i32>} : memref<2x16x16xf32, #tpu.memory_space<vmem>>, vector<1x16x16xf32>,
    %76 = vector.extract_strided_slice %57 {offsets = [0, 16], sizes = [16, 16], strides = [1, 1]} : vector<16x32xf32> to vector<16x16xf32>
    %c1_53 = arith.constant 1 : index
    %c0_54 = arith.constant 0 : index
    %c0_55 = arith.constant 0 : index
    %77 = vector.load %arg8[%c1_53, %c0_54, %c0_55] : memref<2x16x16xf32, #tpu.memory_space<vmem>>, vector<1x16x16xf32>
    %78 = vector.shape_cast %77 : vector<1x16x16xf32> to vector<16x16xf32>
    %79 = vector.shape_cast %76 : vector<16x16xf32> to vector<1x16x16xf32>
    tpu.vector_store %arg8[%c1_53, %c0_54, %c0_55], %79 {strides = array<i32>} : memref<2x16x16xf32, #tpu.memory_space<vmem>>, vector<1x16x16xf32>,
    %80 = vector.extract_strided_slice %60 {offsets = [0, 16], sizes = [16, 16], strides = [1, 1]} : vector<16x32xf32> to vector<16x16xf32>
    %c1_56 = arith.constant 1 : index
    %c0_57 = arith.constant 0 : index
    %c0_58 = arith.constant 0 : index
    %81 = vector.load %arg9[%c1_56, %c0_57, %c0_58] : memref<2x16x16xf32, #tpu.memory_space<vmem>>, vector<1x16x16xf32>
    %82 = vector.shape_cast %81 : vector<1x16x16xf32> to vector<16x16xf32>
    %83 = vector.shape_cast %80 : vector<16x16xf32> to vector<1x16x16xf32>
    tpu.vector_store %arg9[%c1_56, %c0_57, %c0_58], %83 {strides = array<i32>} : memref<2x16x16xf32, #tpu.memory_space<vmem>>, vector<1x16x16xf32>,
    %84 = vector.extract_strided_slice %63 {offsets = [0, 16], sizes = [16, 16], strides = [1, 1]} : vector<16x32xf32> to vector<16x16xf32>
    %c1_59 = arith.constant 1 : index
    %c0_60 = arith.constant 0 : index
    %c0_61 = arith.constant 0 : index
    %85 = vector.load %arg10[%c1_59, %c0_60, %c0_61] : memref<2x16x16xf32, #tpu.memory_space<vmem>>, vector<1x16x16xf32>
    %86 = vector.shape_cast %85 : vector<1x16x16xf32> to vector<16x16xf32>
    %87 = vector.shape_cast %84 : vector<16x16xf32> to vector<1x16x16xf32>
    tpu.vector_store %arg10[%c1_59, %c0_60, %c0_61], %87 {strides = array<i32>} : memref<2x16x16xf32, #tpu.memory_space<vmem>>, vector<1x16x16xf32>,
    %c0_62 = arith.constant 0 : index
    %c0_63 = arith.constant 0 : index
    %c0_64 = arith.constant 0 : index
    %88 = vector.load %arg8[%c0_62, %c0_63, %c0_64] : memref<2x16x16xf32, #tpu.memory_space<vmem>>, vector<2x16x16xf32>
    %c0_65 = arith.constant 0 : index
    %c0_66 = arith.constant 0 : index
    %c0_67 = arith.constant 0 : index
    %89 = vector.load %arg9[%c0_65, %c0_66, %c0_67] : memref<2x16x16xf32, #tpu.memory_space<vmem>>, vector<2x16x16xf32>
    "tpu.trace_start"() <{level = 10 : i32, message = "hqd,hkd->hqk"}> : () -> ()
    %cst_68 = arith.constant dense<0.000000e+00> : vector<2x16x16xf32>
    %90 = tpu.matmul %88, %89, %cst_68 {dimension_numbers = #tpu.dot_dimension_numbers<[2], [2], [1], [1], [0, 0, 0, 1, 1, 1], [0], [0]>} : vector<2x16x16xf32>, vector<2x16x16xf32>, vector<2x16x16xf32> -> vector<2x16x16xf32>
    "tpu.trace_stop"() : () -> ()
    %cst_69 = arith.constant 2.500000e-01 : f32
    %91 = vector.broadcast %cst_69 : f32 to vector<2x16x16xf32>
    %92 = arith.mulf %90, %91 : vector<2x16x16xf32>
    %93 = vector.shape_cast %2 : vector<16x16xf32> to vector<1x16x16xf32>
    %94 = vector.broadcast %93 : vector<1x16x16xf32> to vector<2x16x16xf32>
    %95 = arith.addf %92, %94 : vector<2x16x16xf32>
    %cst_70 = arith.constant dense<0xFF800000> : vector<2x16xf32>
    %96 = vector.multi_reduction <maximumf>, %95, %cst_70 [2] : vector<2x16x16xf32> to vector<2x16xf32>
    %97 = vector.shape_cast %96 : vector<2x16xf32> to vector<2x16x1xf32>
    %98 = vector.broadcast %97 : vector<2x16x1xf32> to vector<2x16x16xf32>
    %99 = arith.subf %95, %98 : vector<2x16x16xf32>
    %100 = math.exp %99 : vector<2x16x16xf32>
    %cst_71 = arith.constant dense<0.000000e+00> : vector<2x16xf32>
    %101 = vector.multi_reduction <add>, %100, %cst_71 [2] : vector<2x16x16xf32> to vector<2x16xf32>
    %102 = vector.shape_cast %101 : vector<2x16xf32> to vector<2x16x1xf32>
    %103 = vector.broadcast %102 : vector<2x16x1xf32> to vector<2x16x16xf32>
    %104 = arith.divf %100, %103 : vector<2x16x16xf32>
    %c0_72 = arith.constant 0 : index
    %c0_73 = arith.constant 0 : index
    %c0_74 = arith.constant 0 : index
    %105 = vector.load %arg10[%c0_72, %c0_73, %c0_74] : memref<2x16x16xf32, #tpu.memory_space<vmem>>, vector<2x16x16xf32>
    "tpu.trace_start"() <{level = 10 : i32, message = "hqk,hkd->hqd"}> : () -> ()
    %cst_75 = arith.constant dense<0.000000e+00> : vector<2x16x16xf32>
    %106 = tpu.matmul %104, %105, %cst_75 {dimension_numbers = #tpu.dot_dimension_numbers<[2], [1], [1], [2], [0, 0, 0, 1, 1, 2], [0], [0]>} : vector<2x16x16xf32>, vector<2x16x16xf32>, vector<2x16x16xf32> -> vector<2x16x16xf32>
    "tpu.trace_stop"() : () -> ()
    %c0_76 = arith.constant 0 : index
    %c96 = arith.constant 96 : index
    %c0_77 = arith.constant 0 : index
    %107 = vector.load %arg3[%c0_76, %c96, %c0_77] : memref<2x192x32xf32, #tpu.memory_space<vmem>>, vector<1x16x32xf32>
    %108 = vector.shape_cast %107 : vector<1x16x32xf32> to vector<16x32xf32>
    %109 = vector.extract_strided_slice %106 {offsets = [0, 0, 0], sizes = [1, 16, 16], strides = [1, 1, 1]} : vector<2x16x16xf32> to vector<1x16x16xf32>
    %110 = vector.shape_cast %109 : vector<1x16x16xf32> to vector<16x16xf32>
    %cst_78 = arith.constant dense<0.000000e+00> : vector<16x32xf32>
    %111 = tpu.matmul %110, %108, %cst_78 {dimension_numbers = #tpu.dot_dimension_numbers<[1], [0], [0], [1], [0, 0, 1, 1], [], []>} : vector<16x16xf32>, vector<16x32xf32>, vector<16x32xf32> -> vector<16x32xf32>
    %112 = vector.broadcast %24 : vector<1x32xf32> to vector<16x32xf32>
    %113 = arith.addf %112, %111 : vector<16x32xf32>
    %c0_79 = arith.constant 0 : index
    %c112 = arith.constant 112 : index
    %c0_80 = arith.constant 0 : index
    %114 = vector.load %arg3[%c0_79, %c112, %c0_80] : memref<2x192x32xf32, #tpu.memory_space<vmem>>, vector<1x16x32xf32>
    %115 = vector.shape_cast %114 : vector<1x16x32xf32> to vector<16x32xf32>
    %116 = vector.extract_strided_slice %106 {offsets = [1, 0, 0], sizes = [1, 16, 16], strides = [1, 1, 1]} : vector<2x16x16xf32> to vector<1x16x16xf32>
    %117 = vector.shape_cast %116 : vector<1x16x16xf32> to vector<16x16xf32>
    %cst_81 = arith.constant dense<0.000000e+00> : vector<16x32xf32>
    %118 = tpu.matmul %117, %115, %cst_81 {dimension_numbers = #tpu.dot_dimension_numbers<[1], [0], [0], [1], [0, 0, 1, 1], [], []>} : vector<16x16xf32>, vector<16x32xf32>, vector<16x32xf32> -> vector<16x32xf32>
    %119 = arith.addf %113, %118 : vector<16x32xf32>
    %120 = arith.addf %54, %119 : vector<16x32xf32>
    %cst_82 = arith.constant dense<0.000000e+00> : vector<16xf32>
    %121 = vector.multi_reduction <add>, %120, %cst_82 [1] : vector<16x32xf32> to vector<16xf32>
    %122 = vector.shape_cast %121 : vector<16xf32> to vector<16x1xf32>
    %cst_83 = arith.constant 3.200000e+01 : f32
    %123 = vector.broadcast %cst_83 : f32 to vector<16x1xf32>
    %124 = arith.divf %122, %123 : vector<16x1xf32>
    %125 = vector.broadcast %124 : vector<16x1xf32> to vector<16x32xf32>
    %126 = arith.subf %120, %125 : vector<16x32xf32>
    %127 = arith.mulf %126, %126 : vector<16x32xf32>
    %cst_84 = arith.constant dense<0.000000e+00> : vector<16xf32>
    %128 = vector.multi_reduction <add>, %127, %cst_84 [1] : vector<16x32xf32> to vector<16xf32>
    %129 = vector.shape_cast %128 : vector<16xf32> to vector<16x1xf32>
    %cst_85 = arith.constant 3.200000e+01 : f32
    %130 = vector.broadcast %cst_85 : f32 to vector<16x1xf32>
    %131 = arith.divf %129, %130 : vector<16x1xf32>
    %132 = vector.broadcast %124 : vector<16x1xf32> to vector<16x32xf32>
    %133 = arith.subf %120, %132 : vector<16x32xf32>
    %cst_86 = arith.constant 9.99999993E-9 : f32
    %134 = vector.broadcast %cst_86 : f32 to vector<16x1xf32>
    %135 = arith.addf %131, %134 : vector<16x1xf32>
    %136 = math.sqrt %135 : vector<16x1xf32>
    %137 = vector.broadcast %136 : vector<16x1xf32> to vector<16x32xf32>
    %138 = arith.divf %133, %137 : vector<16x32xf32>
    %139 = vector.broadcast %26 : vector<1x32xf32> to vector<16x32xf32>
    %140 = arith.mulf %138, %139 : vector<16x32xf32>
    %141 = vector.broadcast %28 : vector<1x32xf32> to vector<16x32xf32>
    %142 = arith.addf %140, %141 : vector<16x32xf32>
    %cst_87 = arith.constant dense<0.000000e+00> : vector<16x32xf32>
    %143 = tpu.matmul %142, %10, %cst_87 {dimension_numbers = #tpu.dot_dimension_numbers<[1], [0], [0], [1], [0, 0, 1, 1], [], []>} : vector<16x32xf32>, vector<32x32xf32>, vector<16x32xf32> -> vector<16x32xf32>
    %144 = vector.broadcast %30 : vector<1x32xf32> to vector<16x32xf32>
    %145 = arith.addf %143, %144 : vector<16x32xf32>
    %cst_88 = arith.constant 0.000000e+00 : f32
    %146 = vector.broadcast %cst_88 : f32 to vector<16x32xf32>
    %147 = arith.maximumf %145, %146 : vector<16x32xf32>
    %cst_89 = arith.constant dense<0.000000e+00> : vector<16x32xf32>
    %148 = tpu.matmul %147, %12, %cst_89 {dimension_numbers = #tpu.dot_dimension_numbers<[1], [0], [0], [1], [0, 0, 1, 1], [], []>} : vector<16x32xf32>, vector<32x32xf32>, vector<16x32xf32> -> vector<16x32xf32>
    %149 = vector.broadcast %32 : vector<1x32xf32> to vector<16x32xf32>
    %150 = arith.addf %148, %149 : vector<16x32xf32>
    %151 = arith.addf %150, %142 : vector<16x32xf32>
    %152 = arith.mulf %151, %1 : vector<16x32xf32>
    %c1_90 = arith.constant 1 : index
    %c0_91 = arith.constant 0 : index
    %c0_92 = arith.constant 0 : index
    %153 = vector.load %arg3[%c1_90, %c0_91, %c0_92] : memref<2x192x32xf32, #tpu.memory_space<vmem>>, vector<1x32x32xf32>
    %154 = vector.shape_cast %153 : vector<1x32x32xf32> to vector<32x32xf32>
    %c1_93 = arith.constant 1 : index
    %c32_94 = arith.constant 32 : index
    %c0_95 = arith.constant 0 : index
    %155 = vector.load %arg3[%c1_93, %c32_94, %c0_95] : memref<2x192x32xf32, #tpu.memory_space<vmem>>, vector<1x32x32xf32>
    %156 = vector.shape_cast %155 : vector<1x32x32xf32> to vector<32x32xf32>
    %c1_96 = arith.constant 1 : index
    %c64_97 = arith.constant 64 : index
    %c0_98 = arith.constant 0 : index
    %157 = vector.load %arg3[%c1_96, %c64_97, %c0_98] : memref<2x192x32xf32, #tpu.memory_space<vmem>>, vector<1x32x32xf32>
    %158 = vector.shape_cast %157 : vector<1x32x32xf32> to vector<32x32xf32>
    %c1_99 = arith.constant 1 : index
    %c128_100 = arith.constant 128 : index
    %c0_101 = arith.constant 0 : index
    %159 = vector.load %arg3[%c1_99, %c128_100, %c0_101] : memref<2x192x32xf32, #tpu.memory_space<vmem>>, vector<1x32x32xf32>
    %160 = vector.shape_cast %159 : vector<1x32x32xf32> to vector<32x32xf32>
    %c1_102 = arith.constant 1 : index
    %c160_103 = arith.constant 160 : index
    %c0_104 = arith.constant 0 : index
    %161 = vector.load %arg3[%c1_102, %c160_103, %c0_104] : memref<2x192x32xf32, #tpu.memory_space<vmem>>, vector<1x32x32xf32>
    %162 = vector.shape_cast %161 : vector<1x32x32xf32> to vector<32x32xf32>
    %c1_105 = arith.constant 1 : index
    %c0_106 = arith.constant 0 : index
    %c0_107 = arith.constant 0 : index
    %163 = vector.load %arg4[%c1_105, %c0_106, %c0_107] : memref<2x10x32xf32, #tpu.memory_space<vmem>>, vector<1x1x32xf32>
    %164 = vector.shape_cast %163 : vector<1x1x32xf32> to vector<1x32xf32>
    %c1_108 = arith.constant 1 : index
    %c1_109 = arith.constant 1 : index
    %c0_110 = arith.constant 0 : index
    %165 = vector.load %arg4[%c1_108, %c1_109, %c0_110] : memref<2x10x32xf32, #tpu.memory_space<vmem>>, vector<1x1x32xf32>
    %166 = vector.shape_cast %165 : vector<1x1x32xf32> to vector<1x32xf32>
    %c1_111 = arith.constant 1 : index
    %c2_112 = arith.constant 2 : index
    %c0_113 = arith.constant 0 : index
    %167 = vector.load %arg4[%c1_111, %c2_112, %c0_113] : memref<2x10x32xf32, #tpu.memory_space<vmem>>, vector<1x1x32xf32>
    %168 = vector.shape_cast %167 : vector<1x1x32xf32> to vector<1x32xf32>
    %c1_114 = arith.constant 1 : index
    %c3_115 = arith.constant 3 : index
    %c0_116 = arith.constant 0 : index
    %169 = vector.load %arg4[%c1_114, %c3_115, %c0_116] : memref<2x10x32xf32, #tpu.memory_space<vmem>>, vector<1x1x32xf32>
    %170 = vector.shape_cast %169 : vector<1x1x32xf32> to vector<1x32xf32>
    %c1_117 = arith.constant 1 : index
    %c4_118 = arith.constant 4 : index
    %c0_119 = arith.constant 0 : index
    %171 = vector.load %arg4[%c1_117, %c4_118, %c0_119] : memref<2x10x32xf32, #tpu.memory_space<vmem>>, vector<1x1x32xf32>
    %172 = vector.shape_cast %171 : vector<1x1x32xf32> to vector<1x32xf32>
    %c1_120 = arith.constant 1 : index
    %c5_121 = arith.constant 5 : index
    %c0_122 = arith.constant 0 : index
    %173 = vector.load %arg4[%c1_120, %c5_121, %c0_122] : memref<2x10x32xf32, #tpu.memory_space<vmem>>, vector<1x1x32xf32>
    %174 = vector.shape_cast %173 : vector<1x1x32xf32> to vector<1x32xf32>
    %c1_123 = arith.constant 1 : index
    %c6_124 = arith.constant 6 : index
    %c0_125 = arith.constant 0 : index
    %175 = vector.load %arg4[%c1_123, %c6_124, %c0_125] : memref<2x10x32xf32, #tpu.memory_space<vmem>>, vector<1x1x32xf32>
    %176 = vector.shape_cast %175 : vector<1x1x32xf32> to vector<1x32xf32>
    %c1_126 = arith.constant 1 : index
    %c7_127 = arith.constant 7 : index
    %c0_128 = arith.constant 0 : index
    %177 = vector.load %arg4[%c1_126, %c7_127, %c0_128] : memref<2x10x32xf32, #tpu.memory_space<vmem>>, vector<1x1x32xf32>
    %178 = vector.shape_cast %177 : vector<1x1x32xf32> to vector<1x32xf32>
    %c1_129 = arith.constant 1 : index
    %c8_130 = arith.constant 8 : index
    %c0_131 = arith.constant 0 : index
    %179 = vector.load %arg4[%c1_129, %c8_130, %c0_131] : memref<2x10x32xf32, #tpu.memory_space<vmem>>, vector<1x1x32xf32>
    %180 = vector.shape_cast %179 : vector<1x1x32xf32> to vector<1x32xf32>
    %c1_132 = arith.constant 1 : index
    %c9_133 = arith.constant 9 : index
    %c0_134 = arith.constant 0 : index
    %181 = vector.load %arg4[%c1_132, %c9_133, %c0_134] : memref<2x10x32xf32, #tpu.memory_space<vmem>>, vector<1x1x32xf32>
    %182 = vector.shape_cast %181 : vector<1x1x32xf32> to vector<1x32xf32>
    %cst_135 = arith.constant dense<0.000000e+00> : vector<16xf32>
    %183 = vector.multi_reduction <add>, %152, %cst_135 [1] : vector<16x32xf32> to vector<16xf32>
    %184 = vector.shape_cast %183 : vector<16xf32> to vector<16x1xf32>
    %cst_136 = arith.constant 3.200000e+01 : f32
    %185 = vector.broadcast %cst_136 : f32 to vector<16x1xf32>
    %186 = arith.divf %184, %185 : vector<16x1xf32>
    %187 = vector.broadcast %186 : vector<16x1xf32> to vector<16x32xf32>
    %188 = arith.subf %152, %187 : vector<16x32xf32>
    %189 = arith.mulf %188, %188 : vector<16x32xf32>
    %cst_137 = arith.constant dense<0.000000e+00> : vector<16xf32>
    %190 = vector.multi_reduction <add>, %189, %cst_137 [1] : vector<16x32xf32> to vector<16xf32>
    %191 = vector.shape_cast %190 : vector<16xf32> to vector<16x1xf32>
    %cst_138 = arith.constant 3.200000e+01 : f32
    %192 = vector.broadcast %cst_138 : f32 to vector<16x1xf32>
    %193 = arith.divf %191, %192 : vector<16x1xf32>
    %194 = vector.broadcast %186 : vector<16x1xf32> to vector<16x32xf32>
    %195 = arith.subf %152, %194 : vector<16x32xf32>
    %cst_139 = arith.constant 9.99999993E-9 : f32
    %196 = vector.broadcast %cst_139 : f32 to vector<16x1xf32>
    %197 = arith.addf %193, %196 : vector<16x1xf32>
    %198 = math.sqrt %197 : vector<16x1xf32>
    %199 = vector.broadcast %198 : vector<16x1xf32> to vector<16x32xf32>
    %200 = arith.divf %195, %199 : vector<16x32xf32>
    %201 = vector.broadcast %164 : vector<1x32xf32> to vector<16x32xf32>
    %202 = arith.mulf %200, %201 : vector<16x32xf32>
    %203 = vector.broadcast %166 : vector<1x32xf32> to vector<16x32xf32>
    %204 = arith.addf %202, %203 : vector<16x32xf32>
    %cst_140 = arith.constant dense<0.000000e+00> : vector<16x32xf32>
    %205 = tpu.matmul %204, %154, %cst_140 {dimension_numbers = #tpu.dot_dimension_numbers<[1], [0], [0], [1], [0, 0, 1, 1], [], []>} : vector<16x32xf32>, vector<32x32xf32>, vector<16x32xf32> -> vector<16x32xf32>
    %206 = vector.broadcast %168 : vector<1x32xf32> to vector<16x32xf32>
    %207 = arith.addf %205, %206 : vector<16x32xf32>
    %cst_141 = arith.constant dense<0.000000e+00> : vector<16x32xf32>
    %208 = tpu.matmul %152, %156, %cst_141 {dimension_numbers = #tpu.dot_dimension_numbers<[1], [0], [0], [1], [0, 0, 1, 1], [], []>} : vector<16x32xf32>, vector<32x32xf32>, vector<16x32xf32> -> vector<16x32xf32>
    %209 = vector.broadcast %170 : vector<1x32xf32> to vector<16x32xf32>
    %210 = arith.addf %208, %209 : vector<16x32xf32>
    %cst_142 = arith.constant dense<0.000000e+00> : vector<16x32xf32>
    %211 = tpu.matmul %152, %158, %cst_142 {dimension_numbers = #tpu.dot_dimension_numbers<[1], [0], [0], [1], [0, 0, 1, 1], [], []>} : vector<16x32xf32>, vector<32x32xf32>, vector<16x32xf32> -> vector<16x32xf32>
    %212 = vector.broadcast %172 : vector<1x32xf32> to vector<16x32xf32>
    %213 = arith.addf %211, %212 : vector<16x32xf32>
    %214 = vector.extract_strided_slice %207 {offsets = [0, 0], sizes = [16, 16], strides = [1, 1]} : vector<16x32xf32> to vector<16x16xf32>
    %c0_143 = arith.constant 0 : index
    %c0_144 = arith.constant 0 : index
    %c0_145 = arith.constant 0 : index
    %215 = vector.load %arg8[%c0_143, %c0_144, %c0_145] : memref<2x16x16xf32, #tpu.memory_space<vmem>>, vector<1x16x16xf32>
    %216 = vector.shape_cast %215 : vector<1x16x16xf32> to vector<16x16xf32>
    %217 = vector.shape_cast %214 : vector<16x16xf32> to vector<1x16x16xf32>
    tpu.vector_store %arg8[%c0_143, %c0_144, %c0_145], %217 {strides = array<i32>} : memref<2x16x16xf32, #tpu.memory_space<vmem>>, vector<1x16x16xf32>,
    %218 = vector.extract_strided_slice %210 {offsets = [0, 0], sizes = [16, 16], strides = [1, 1]} : vector<16x32xf32> to vector<16x16xf32>
    %c0_146 = arith.constant 0 : index
    %c0_147 = arith.constant 0 : index
    %c0_148 = arith.constant 0 : index
    %219 = vector.load %arg9[%c0_146, %c0_147, %c0_148] : memref<2x16x16xf32, #tpu.memory_space<vmem>>, vector<1x16x16xf32>
    %220 = vector.shape_cast %219 : vector<1x16x16xf32> to vector<16x16xf32>
    %221 = vector.shape_cast %218 : vector<16x16xf32> to vector<1x16x16xf32>
    tpu.vector_store %arg9[%c0_146, %c0_147, %c0_148], %221 {strides = array<i32>} : memref<2x16x16xf32, #tpu.memory_space<vmem>>, vector<1x16x16xf32>,
    %222 = vector.extract_strided_slice %213 {offsets = [0, 0], sizes = [16, 16], strides = [1, 1]} : vector<16x32xf32> to vector<16x16xf32>
    %c0_149 = arith.constant 0 : index
    %c0_150 = arith.constant 0 : index
    %c0_151 = arith.constant 0 : index
    %223 = vector.load %arg10[%c0_149, %c0_150, %c0_151] : memref<2x16x16xf32, #tpu.memory_space<vmem>>, vector<1x16x16xf32>
    %224 = vector.shape_cast %223 : vector<1x16x16xf32> to vector<16x16xf32>
    %225 = vector.shape_cast %222 : vector<16x16xf32> to vector<1x16x16xf32>
    tpu.vector_store %arg10[%c0_149, %c0_150, %c0_151], %225 {strides = array<i32>} : memref<2x16x16xf32, #tpu.memory_space<vmem>>, vector<1x16x16xf32>,
    %226 = vector.extract_strided_slice %207 {offsets = [0, 16], sizes = [16, 16], strides = [1, 1]} : vector<16x32xf32> to vector<16x16xf32>
    %c1_152 = arith.constant 1 : index
    %c0_153 = arith.constant 0 : index
    %c0_154 = arith.constant 0 : index
    %227 = vector.load %arg8[%c1_152, %c0_153, %c0_154] : memref<2x16x16xf32, #tpu.memory_space<vmem>>, vector<1x16x16xf32>
    %228 = vector.shape_cast %227 : vector<1x16x16xf32> to vector<16x16xf32>
    %229 = vector.shape_cast %226 : vector<16x16xf32> to vector<1x16x16xf32>
    tpu.vector_store %arg8[%c1_152, %c0_153, %c0_154], %229 {strides = array<i32>} : memref<2x16x16xf32, #tpu.memory_space<vmem>>, vector<1x16x16xf32>,
    %230 = vector.extract_strided_slice %210 {offsets = [0, 16], sizes = [16, 16], strides = [1, 1]} : vector<16x32xf32> to vector<16x16xf32>
    %c1_155 = arith.constant 1 : index
    %c0_156 = arith.constant 0 : index
    %c0_157 = arith.constant 0 : index
    %231 = vector.load %arg9[%c1_155, %c0_156, %c0_157] : memref<2x16x16xf32, #tpu.memory_space<vmem>>, vector<1x16x16xf32>
    %232 = vector.shape_cast %231 : vector<1x16x16xf32> to vector<16x16xf32>
    %233 = vector.shape_cast %230 : vector<16x16xf32> to vector<1x16x16xf32>
    tpu.vector_store %arg9[%c1_155, %c0_156, %c0_157], %233 {strides = array<i32>} : memref<2x16x16xf32, #tpu.memory_space<vmem>>, vector<1x16x16xf32>,
    %234 = vector.extract_strided_slice %213 {offsets = [0, 16], sizes = [16, 16], strides = [1, 1]} : vector<16x32xf32> to vector<16x16xf32>
    %c1_158 = arith.constant 1 : index
    %c0_159 = arith.constant 0 : index
    %c0_160 = arith.constant 0 : index
    %235 = vector.load %arg10[%c1_158, %c0_159, %c0_160] : memref<2x16x16xf32, #tpu.memory_space<vmem>>, vector<1x16x16xf32>
    %236 = vector.shape_cast %235 : vector<1x16x16xf32> to vector<16x16xf32>
    %237 = vector.shape_cast %234 : vector<16x16xf32> to vector<1x16x16xf32>
    tpu.vector_store %arg10[%c1_158, %c0_159, %c0_160], %237 {strides = array<i32>} : memref<2x16x16xf32, #tpu.memory_space<vmem>>, vector<1x16x16xf32>,
    %c0_161 = arith.constant 0 : index
    %c0_162 = arith.constant 0 : index
    %c0_163 = arith.constant 0 : index
    %238 = vector.load %arg8[%c0_161, %c0_162, %c0_163] : memref<2x16x16xf32, #tpu.memory_space<vmem>>, vector<2x16x16xf32>
    %c0_164 = arith.constant 0 : index
    %c0_165 = arith.constant 0 : index
    %c0_166 = arith.constant 0 : index
    %239 = vector.load %arg9[%c0_164, %c0_165, %c0_166] : memref<2x16x16xf32, #tpu.memory_space<vmem>>, vector<2x16x16xf32>
    "tpu.trace_start"() <{level = 10 : i32, message = "hqd,hkd->hqk"}> : () -> ()
    %cst_167 = arith.constant dense<0.000000e+00> : vector<2x16x16xf32>
    %240 = tpu.matmul %238, %239, %cst_167 {dimension_numbers = #tpu.dot_dimension_numbers<[2], [2], [1], [1], [0, 0, 0, 1, 1, 1], [0], [0]>} : vector<2x16x16xf32>, vector<2x16x16xf32>, vector<2x16x16xf32> -> vector<2x16x16xf32>
    "tpu.trace_stop"() : () -> ()
    %cst_168 = arith.constant 2.500000e-01 : f32
    %241 = vector.broadcast %cst_168 : f32 to vector<2x16x16xf32>
    %242 = arith.mulf %240, %241 : vector<2x16x16xf32>
    %243 = vector.shape_cast %2 : vector<16x16xf32> to vector<1x16x16xf32>
    %244 = vector.broadcast %243 : vector<1x16x16xf32> to vector<2x16x16xf32>
    %245 = arith.addf %242, %244 : vector<2x16x16xf32>
    %cst_169 = arith.constant dense<0xFF800000> : vector<2x16xf32>
    %246 = vector.multi_reduction <maximumf>, %245, %cst_169 [2] : vector<2x16x16xf32> to vector<2x16xf32>
    %247 = vector.shape_cast %246 : vector<2x16xf32> to vector<2x16x1xf32>
    %248 = vector.broadcast %247 : vector<2x16x1xf32> to vector<2x16x16xf32>
    %249 = arith.subf %245, %248 : vector<2x16x16xf32>
    %250 = math.exp %249 : vector<2x16x16xf32>
    %cst_170 = arith.constant dense<0.000000e+00> : vector<2x16xf32>
    %251 = vector.multi_reduction <add>, %250, %cst_170 [2] : vector<2x16x16xf32> to vector<2x16xf32>
    %252 = vector.shape_cast %251 : vector<2x16xf32> to vector<2x16x1xf32>
    %253 = vector.broadcast %252 : vector<2x16x1xf32> to vector<2x16x16xf32>
    %254 = arith.divf %250, %253 : vector<2x16x16xf32>
    %c0_171 = arith.constant 0 : index
    %c0_172 = arith.constant 0 : index
    %c0_173 = arith.constant 0 : index
    %255 = vector.load %arg10[%c0_171, %c0_172, %c0_173] : memref<2x16x16xf32, #tpu.memory_space<vmem>>, vector<2x16x16xf32>
    "tpu.trace_start"() <{level = 10 : i32, message = "hqk,hkd->hqd"}> : () -> ()
    %cst_174 = arith.constant dense<0.000000e+00> : vector<2x16x16xf32>
    %256 = tpu.matmul %254, %255, %cst_174 {dimension_numbers = #tpu.dot_dimension_numbers<[2], [1], [1], [2], [0, 0, 0, 1, 1, 2], [0], [0]>} : vector<2x16x16xf32>, vector<2x16x16xf32>, vector<2x16x16xf32> -> vector<2x16x16xf32>
    "tpu.trace_stop"() : () -> ()
    %c1_175 = arith.constant 1 : index
    %c96_176 = arith.constant 96 : index
    %c0_177 = arith.constant 0 : index
    %257 = vector.load %arg3[%c1_175, %c96_176, %c0_177] : memref<2x192x32xf32, #tpu.memory_space<vmem>>, vector<1x16x32xf32>
    %258 = vector.shape_cast %257 : vector<1x16x32xf32> to vector<16x32xf32>
    %259 = vector.extract_strided_slice %256 {offsets = [0, 0, 0], sizes = [1, 16, 16], strides = [1, 1, 1]} : vector<2x16x16xf32> to vector<1x16x16xf32>
    %260 = vector.shape_cast %259 : vector<1x16x16xf32> to vector<16x16xf32>
    %cst_178 = arith.constant dense<0.000000e+00> : vector<16x32xf32>
    %261 = tpu.matmul %260, %258, %cst_178 {dimension_numbers = #tpu.dot_dimension_numbers<[1], [0], [0], [1], [0, 0, 1, 1], [], []>} : vector<16x16xf32>, vector<16x32xf32>, vector<16x32xf32> -> vector<16x32xf32>
    %262 = vector.broadcast %174 : vector<1x32xf32> to vector<16x32xf32>
    %263 = arith.addf %262, %261 : vector<16x32xf32>
    %c1_179 = arith.constant 1 : index
    %c112_180 = arith.constant 112 : index
    %c0_181 = arith.constant 0 : index
    %264 = vector.load %arg3[%c1_179, %c112_180, %c0_181] : memref<2x192x32xf32, #tpu.memory_space<vmem>>, vector<1x16x32xf32>
    %265 = vector.shape_cast %264 : vector<1x16x32xf32> to vector<16x32xf32>
    %266 = vector.extract_strided_slice %256 {offsets = [1, 0, 0], sizes = [1, 16, 16], strides = [1, 1, 1]} : vector<2x16x16xf32> to vector<1x16x16xf32>
    %267 = vector.shape_cast %266 : vector<1x16x16xf32> to vector<16x16xf32>
    %cst_182 = arith.constant dense<0.000000e+00> : vector<16x32xf32>
    %268 = tpu.matmul %267, %265, %cst_182 {dimension_numbers = #tpu.dot_dimension_numbers<[1], [0], [0], [1], [0, 0, 1, 1], [], []>} : vector<16x16xf32>, vector<16x32xf32>, vector<16x32xf32> -> vector<16x32xf32>
    %269 = arith.addf %263, %268 : vector<16x32xf32>
    %270 = arith.addf %204, %269 : vector<16x32xf32>
    %cst_183 = arith.constant dense<0.000000e+00> : vector<16xf32>
    %271 = vector.multi_reduction <add>, %270, %cst_183 [1] : vector<16x32xf32> to vector<16xf32>
    %272 = vector.shape_cast %271 : vector<16xf32> to vector<16x1xf32>
    %cst_184 = arith.constant 3.200000e+01 : f32
    %273 = vector.broadcast %cst_184 : f32 to vector<16x1xf32>
    %274 = arith.divf %272, %273 : vector<16x1xf32>
    %275 = vector.broadcast %274 : vector<16x1xf32> to vector<16x32xf32>
    %276 = arith.subf %270, %275 : vector<16x32xf32>
    %277 = arith.mulf %276, %276 : vector<16x32xf32>
    %cst_185 = arith.constant dense<0.000000e+00> : vector<16xf32>
    %278 = vector.multi_reduction <add>, %277, %cst_185 [1] : vector<16x32xf32> to vector<16xf32>
    %279 = vector.shape_cast %278 : vector<16xf32> to vector<16x1xf32>
    %cst_186 = arith.constant 3.200000e+01 : f32
    %280 = vector.broadcast %cst_186 : f32 to vector<16x1xf32>
    %281 = arith.divf %279, %280 : vector<16x1xf32>
    %282 = vector.broadcast %274 : vector<16x1xf32> to vector<16x32xf32>
    %283 = arith.subf %270, %282 : vector<16x32xf32>
    %cst_187 = arith.constant 9.99999993E-9 : f32
    %284 = vector.broadcast %cst_187 : f32 to vector<16x1xf32>
    %285 = arith.addf %281, %284 : vector<16x1xf32>
    %286 = math.sqrt %285 : vector<16x1xf32>
    %287 = vector.broadcast %286 : vector<16x1xf32> to vector<16x32xf32>
    %288 = arith.divf %283, %287 : vector<16x32xf32>
    %289 = vector.broadcast %176 : vector<1x32xf32> to vector<16x32xf32>
    %290 = arith.mulf %288, %289 : vector<16x32xf32>
    %291 = vector.broadcast %178 : vector<1x32xf32> to vector<16x32xf32>
    %292 = arith.addf %290, %291 : vector<16x32xf32>
    %cst_188 = arith.constant dense<0.000000e+00> : vector<16x32xf32>
    %293 = tpu.matmul %292, %160, %cst_188 {dimension_numbers = #tpu.dot_dimension_numbers<[1], [0], [0], [1], [0, 0, 1, 1], [], []>} : vector<16x32xf32>, vector<32x32xf32>, vector<16x32xf32> -> vector<16x32xf32>
    %294 = vector.broadcast %180 : vector<1x32xf32> to vector<16x32xf32>
    %295 = arith.addf %293, %294 : vector<16x32xf32>
    %cst_189 = arith.constant 0.000000e+00 : f32
    %296 = vector.broadcast %cst_189 : f32 to vector<16x32xf32>
    %297 = arith.maximumf %295, %296 : vector<16x32xf32>
    %cst_190 = arith.constant dense<0.000000e+00> : vector<16x32xf32>
    %298 = tpu.matmul %297, %162, %cst_190 {dimension_numbers = #tpu.dot_dimension_numbers<[1], [0], [0], [1], [0, 0, 1, 1], [], []>} : vector<16x32xf32>, vector<32x32xf32>, vector<16x32xf32> -> vector<16x32xf32>
    %299 = vector.broadcast %182 : vector<1x32xf32> to vector<16x32xf32>
    %300 = arith.addf %298, %299 : vector<16x32xf32>
    %301 = arith.addf %300, %292 : vector<16x32xf32>
    %302 = arith.mulf %301, %1 : vector<16x32xf32>
    %c0_191 = arith.constant 0 : index
    %c0_192 = arith.constant 0 : index
    %303 = vector.load %arg5[%c0_191, %c0_192] : memref<2x32xf32, #tpu.memory_space<vmem>>, vector<1x32xf32>
    %c1_193 = arith.constant 1 : index
    %c0_194 = arith.constant 0 : index
    %304 = vector.load %arg5[%c1_193, %c0_194] : memref<2x32xf32, #tpu.memory_space<vmem>>, vector<1x32xf32>
    %cst_195 = arith.constant dense<0.000000e+00> : vector<16xf32>
    %305 = vector.multi_reduction <add>, %302, %cst_195 [1] : vector<16x32xf32> to vector<16xf32>
    %306 = vector.shape_cast %305 : vector<16xf32> to vector<16x1xf32>
    %cst_196 = arith.constant 3.200000e+01 : f32
    %307 = vector.broadcast %cst_196 : f32 to vector<16x1xf32>
    %308 = arith.divf %306, %307 : vector<16x1xf32>
    %309 = vector.broadcast %308 : vector<16x1xf32> to vector<16x32xf32>
    %310 = arith.subf %302, %309 : vector<16x32xf32>
    %311 = arith.mulf %310, %310 : vector<16x32xf32>
    %cst_197 = arith.constant dense<0.000000e+00> : vector<16xf32>
    %312 = vector.multi_reduction <add>, %311, %cst_197 [1] : vector<16x32xf32> to vector<16xf32>
    %313 = vector.shape_cast %312 : vector<16xf32> to vector<16x1xf32>
    %cst_198 = arith.constant 3.200000e+01 : f32
    %314 = vector.broadcast %cst_198 : f32 to vector<16x1xf32>
    %315 = arith.divf %313, %314 : vector<16x1xf32>
    %316 = vector.broadcast %308 : vector<16x1xf32> to vector<16x32xf32>
    %317 = arith.subf %302, %316 : vector<16x32xf32>
    %cst_199 = arith.constant 9.99999993E-9 : f32
    %318 = vector.broadcast %cst_199 : f32 to vector<16x1xf32>
    %319 = arith.addf %315, %318 : vector<16x1xf32>
    %320 = math.sqrt %319 : vector<16x1xf32>
    %321 = vector.broadcast %320 : vector<16x1xf32> to vector<16x32xf32>
    %322 = arith.divf %317, %321 : vector<16x32xf32>
    %323 = vector.broadcast %303 : vector<1x32xf32> to vector<16x32xf32>
    %324 = arith.mulf %322, %323 : vector<16x32xf32>
    %325 = vector.broadcast %304 : vector<1x32xf32> to vector<16x32xf32>
    %326 = arith.addf %324, %325 : vector<16x32xf32>
    %327 = vector.shape_cast %326 : vector<16x32xf32> to vector<1x16x32xf32>
    %c0_200 = arith.constant 0 : index
    %c0_201 = arith.constant 0 : index
    %c0_202 = arith.constant 0 : index
    %328 = vector.load %arg6[%c0_200, %c0_201, %c0_202] : memref<2x16x32xf32, #tpu.memory_space<vmem>>, vector<2x16x32xf32>
    %329 = vector.broadcast %327 : vector<1x16x32xf32> to vector<2x16x32xf32>
    %330 = arith.mulf %329, %328 : vector<2x16x32xf32>
    %cst_203 = arith.constant dense<0.000000e+00> : vector<2x16xf32>
    %331 = vector.multi_reduction <add>, %330, %cst_203 [2] : vector<2x16x32xf32> to vector<2x16xf32>
    %c0_204 = arith.constant 0 : index
    %c0_205 = arith.constant 0 : index
    %332 = vector.load %arg7[%c0_204, %c0_205] : memref<2x16xf32, #tpu.memory_space<vmem>>, vector<2x16xf32>
    tpu.vector_store %arg7[%c0_204, %c0_205], %331 {strides = array<i32>} : memref<2x16xf32, #tpu.memory_space<vmem>>, vector<2x16xf32>,
    return
  }
}

</mosaic_0001>

<bundles_post_ra>
// kernel: squeeze.3
= control target key start
LH: loop header
LB: loop body
LE: loop exit
PB: predicated region body
PF: predicated region fallthrough
CT: control target
= control target key end

     0   :  { %s80_s0 = inlined_call_operand.vmem [shape: f32[16], index: 0, kind: input, shape index: {}]   ;;  %s81_s1 = inlined_call_operand.hbm [shape: f32[2,8], index: 1, kind: output, shape index: {}]  }
   0x1   :  { %v5_v0 = vld [vmem:[%s80_s0] sm:$0x1] }
   0x2   :  { %2 = vsyncpa [#allocation1], 0  ;;  %6 = vst [vmem:[#allocation3] sm:$0x1] %v5_v0  ;;  %vm8_vm0 = vcmask 64512   ;;  %s62_s0 = smov 120  }
   0x3   :  { %s63_s8 = smov [#allocation0]   ;;  %s27_s1 = sshll.u32 %s81_s1, 4  ;;  %s28_s1 = int_to_ptr.hbm [resolvable:$true] %s27_s1 }
   0x4   :  { %s25_s9 = sshll.u32 %s63_s8, 4  ;;  %s26_s9 = int_to_ptr.vmem [resolvable:$true] %s25_s9 }
   0x9   :  { %v10_v1 = vld [vmem:[#allocation3] sm:$0x1]  }
   0xa   :  { %v7_v2 = vld [vmem:[#allocation3] sm:$0x1]   ;;  %11 = vrot.lane.b32.xlu0 %v10_v1, %s62_s0 }
   0xb   :  { %9 = vst.msk [vmem:[#allocation2] sm:$0x1] %vm8_vm0, %v7_v2  }
  0x7c   :  { %v12_v3 = vpop.permute.xlu0 %11  }
  0x7d   :  { %15 = vst.msk [vmem:[#allocation2 + $0x1] sm:$0x1] %vm8_vm0, %v12_v3  }
  0x84   :  { %v18_v4 = vld [vmem:[#allocation2] sm:$0x3] }
  0x85   :  { %21 = vst [vmem:[#allocation0] sm:$0x3] %v18_v4 }
  0x86   :  { %30 = dma.vmem_to_hbm [thread:$0]  %s26_s9, 32, %s28_s1, [#allocation1]  }
  0x87   :  { %60 = dma.done.wait [#allocation1], 32  }
  0x88   :  { %61 = vsyncadd [#allocation1], 4294967264 }
  0x89   :  { %33 = vsyncpa [#allocation1], 1 }

// kernel: sasrec_forward.1
= control target key start
LH: loop header
LB: loop body
LE: loop exit
PB: predicated region body
PF: predicated region fallthrough
CT: control target
= control target key end

     0   :  { %vm62_vm0 = vcmask 261120   ;;  %v1751_v4 = vmov 32.0   ;;  %vm236_vm14 = vcmask 130048   ;;  %s1752_s26 = smov 112   ;;  %s2312_s0 = inlined_call_operand.vmem [shape: f32[16,32], index: 0, kind: input, shape index: {}]   ;;  %s2313_s4 = inlined_call_operand.vmem [shape: f32[2,10,32], index: 4, kind: input, shape index: {}]   ;;  %s2314_s3 = inlined_call_operand.vmem [shape: f32[2,192,32], index: 3, kind: input, shape index: {}]   ;;  %s2315_s2 = inlined_call_operand.vmem [shape: f32[16,16], index: 2, kind: input, shape index: {}]   ;;  %s2316_s1 = inlined_call_operand.vmem [shape: f32[16,32], index: 1, kind: input, shape index: {}]   ;;  %s2317_s5 = inlined_call_operand.vmem [shape: f32[2,32], index: 5, kind: input, shape index: {}]   ;;  %s2318_s6 = inlined_call_operand.vmem [shape: f32[2,16,32], index: 6, kind: input, shape index: {}]   ;;  %s2319_s7 = inlined_call_operand.vmem [shape: f32[2,16], index: 7, kind: output, shape index: {}]  }
   0x1   :  { %v1796_v0 = vld [vmem:[%s2312_s0] sm:$0xff]  ;;  %v1803_v2 = vld [vmem:[%s2312_s0 + $0x8] sm:$0xff]  ;;  %1677 = vrcp.f32 %v1751_v4  ;;  %v39_v21 = vld [vmem:[%s2314_s3 + $0x38] sm:$0xff] }
   0x2   :  { %v63_v1 = vsel %vm62_vm0, %v1796_v0, 0.0  ;;  %v66_v3 = vsel %vm62_vm0, %v1803_v2, 0.0  ;;  %v38_v22 = vld [vmem:[%s2314_s3 + $0x30] sm:$0xff]  ;;  %1649 = vmatpush.msra.mxu3 %v39_v21  ;;  %201 = vmatpush.msra.mxu1 %v39_v21  ;;  %v35_v23 = vld [vmem:[%s2314_s3 + $0x18] sm:$0xff]  ;;  %v37_v25 = vld [vmem:[%s2314_s3 + $0x28] sm:$0xff] }
   0x3   :  { %64 = vadd.xlane.f32.xlu0 %v63_v1  ;;  %v34_v24 = vld [vmem:[%s2314_s3 + $0x10] sm:$0xff]  ;;  %171 = vmatpush.msra.mxu0 %v35_v23  ;;  %v33_v26 = vld [vmem:[%s2314_s3 + $0x8] sm:$0xff]  ;;  %v36_v27 = vld [vmem:[%s2314_s3 + $0x20] sm:$0xff] }
   0x4   :  { %1645 = vmatpush.msra.mxu2 %v35_v23  ;;  %1650 = vmatpush.msra.mxu3 %v38_v22  ;;  %v32_v29 = vld [vmem:[%s2314_s3] sm:$0xff] }
   0x5   :  { %202 = vmatpush.msra.mxu1 %v38_v22  ;;  %172 = vmatpush.msra.mxu0 %v34_v24  ;;  %v1657_v23 = vld [vmem:[%s2313_s4 + $0x3] ss:$0 sm:$0xff] }
   0x6   :  { %1646 = vmatpush.msra.mxu2 %v34_v24  ;;  %1651 = vmatpush.msra.mxu3 %v37_v25 }
   0x7   :  { %v1678_v5 = vpop.eup %1677  ;;  %203 = vmatpush.msra.mxu1 %v37_v25  ;;  %173 = vmatpush.msra.mxu0 %v33_v26 }
   0x8   :  { %v70_v6 = vmul.f32 32.0, %v1678_v5  ;;  %vm74_vm1 = vweird.f32 %v1678_v5  ;;  %1647 = vmatpush.msra.mxu2 %v33_v26  ;;  %1652 = vmatpush.msra.mxu3 %v36_v27 }
   0x9   :  { %204 = vmatpush.msra.mxu1 %v36_v27  ;;  %1562 = vmatmul.msk.f32.vlgmr.msra.gmra.mxu3 %vm62_vm0, %v1803_v2 }
   0xa   :  { %v71_v7 = vsub.f32 1.0, %v70_v6  ;;  %1561 = vmatmul.msk.f32.vlgmr.msra.gmra.mxu1 %vm62_vm0, %v1796_v0  ;;  %174 = vmatpush.msra.mxu0 %v32_v29 }
   0xb   :  { %67 = vadd.xlane.f32.xlu0 %v66_v3  ;;  %1648 = vmatpush.msra.mxu2 %v32_v29  ;;  %v1655_v3 = vld [vmem:[%s2313_s4] ss:$0 sm:$0xff]  ;;  %v1658_v29 = vld [vmem:[%s2313_s4 + $0x2] ss:$0 sm:$0xff] }
   0xc   :  { %v72_v8 = vmul.f32 %v1678_v5, %v71_v7 }
   0xe   :  { %v73_v9 = vadd.f32 %v1678_v5, %v72_v8  ;;  %v1656_v8 = vld [vmem:[%s2313_s4 + $0x1] ss:$0 sm:$0xff] }
  0x10   :  { %v1807_v10 = vsel %vm74_vm1, %v1678_v5, %v73_v9 }
  0x76   :  { %v65_v11 = vpop.xlane.xlu0 %64 }
  0x77   :  { %v76_v12 = vmul.f32 %v1807_v10, %v65_v11 }
  0x79   :  { %v1811_v13 = vsub.f32 %v1796_v0, %v76_v12 }
  0x7b   :  { %v80_v14 = vmul.f32 %v1811_v13, %v1811_v13 }
  0x7d   :  { %v82_v15 = vsel %vm62_vm0, %v80_v14, 0.0 }
  0x7e   :  { %83 = vadd.xlane.f32.xlu1 %v82_v15  ;;  %v68_v16 = vpop.xlane.xlu0 %67 }
  0x7f   :  { %v77_v17 = vmul.f32 %v1807_v10, %v68_v16 }
  0x81   :  { %v1818_v18 = vsub.f32 %v1803_v2, %v77_v17 }
  0x83   :  { %v81_v19 = vmul.f32 %v1818_v18, %v1818_v18 }
  0x85   :  { %v85_v20 = vsel %vm62_vm0, %v81_v19, 0.0 }
  0x86   :  { %86 = vadd.xlane.f32.xlu1 %v85_v20 }
  0x87   :  { %v206_v24 = vpop.f32.mrf.mxu1 }
  0x88   :  { %v207_v25 = vadd.f32 %v1657_v23, %v206_v24 }
  0x8a   :  { %239 = vst.msk [vmem:[#allocation3] sm:$0xff] %vm236_vm14, %v207_v25 }
  0x8c   :  { %v209_v26 = vpop.f32.mrf.mxu3 }
  0x8d   :  { %v210_v27 = vadd.f32 %v1657_v23, %v209_v26 }
  0x8f   :  { %240 = vst.msk [vmem:[#allocation3 + $0x8] sm:$0xff] %vm236_vm14, %v210_v27  ;;  %258 = vrot.lane.b32.xlu2 %v210_v27, %s1752_s26 }
  0x97   :  { %256 = vrot.lane.b32.xlu2 %v207_v25, %s1752_s26 }
  0xf1   :  { %v84_v28 = vpop.xlane.xlu1 %83 }
  0xf2   :  { %v88_v30 = vmul.f32 %v84_v28, %v1807_v10  ;;  %v280_v28 = vld [vmem:[#allocation3] sm:$0xff] }
  0xf4   :  { %v90_v31 = vadd.f32 1e-08, %v88_v30 }
  0xf6   :  { %1679 = vrsqrt.f32 %v90_v31  ;;  %vm99_vm2 = vcmp.eq.f32.partialorder %v90_v31, inf  ;;  %v102_v45 = vand.u32 2147483648, %v90_v31  ;;  %vm101_vm3 = vcmp.eq.f32.partialorder %v90_v31, 0.0 }
  0xf9   :  { %v87_v32 = vpop.xlane.xlu1 %86 }
  0xfa   :  { %v89_v33 = vmul.f32 %v87_v32, %v1807_v10 }
  0xfc   :  { %v1680_v34 = vpop.eup %1679  ;;  %v91_v35 = vadd.f32 1e-08, %v89_v33 }
  0xfd   :  { %v93_v36 = vmul.f32 %v1680_v34, %v90_v31 }
  0xfe   :  { %1681 = vrsqrt.f32 %v91_v35  ;;  %vm111_vm4 = vcmp.eq.f32.partialorder %v91_v35, inf  ;;  %v114_v51 = vand.u32 2147483648, %v91_v35  ;;  %vm113_vm5 = vcmp.eq.f32.partialorder %v91_v35, 0.0 }
  0xff   :  { %v94_v37 = vmul.f32 %v1680_v34, %v93_v36  ;;  %v259_v36 = vpop.permute.xlu2 %258 }
 0x100   :  { %264 = vst.msk [vmem:[#allocation3 + $0x18] sm:$0xff] %vm236_vm14, %v259_v36 }
 0x101   :  { %v95_v38 = vmul.f32 0.5, %v94_v37 }
 0x103   :  { %v96_v39 = vsub.f32 1.5, %v95_v38 }
 0x104   :  { %v1682_v40 = vpop.eup %1681 }
 0x105   :  { %v105_v41 = vmul.f32 %v1682_v40, %v91_v35  ;;  %v97_v42 = vmul.f32 %v1680_v34, %v96_v39 }
 0x107   :  { %v106_v43 = vmul.f32 %v1682_v40, %v105_v41  ;;  %v98_v44 = vmul.f32 %v97_v42, %v90_v31  ;;  %v257_v37 = vpop.permute.xlu2 %256  ;;  %v283_v38 = vld [vmem:[#allocation3 + $0x18] sm:$0xff] }
 0x108   :  { %263 = vst.msk [vmem:[#allocation3 + $0x10] sm:$0xff] %vm236_vm14, %v257_v37  ;;  %1569 = vmatpush.xpose.msk.msrb.mxu0 %vm236_vm14, %v283_v38  ;;  %v43_v42 = vld [vmem:[%s2314_s3 + $0x58] sm:$0xff] }
 0x109   :  { %v107_v46 = vmul.f32 0.5, %v106_v43  ;;  %v100_v47 = vsel %vm99_vm2, %v90_v31, %v98_v44  ;;  %v42_v43 = vld [vmem:[%s2314_s3 + $0x50] sm:$0xff]  ;;  %225 = vmatpush.msrb.mxu2 %v43_v42 }
 0x10a   :  { %v103_v48 = vsel %vm101_vm3, %v102_v45, %v100_v47  ;;  %v41_v45 = vld [vmem:[%s2314_s3 + $0x48] sm:$0xff] }
 0x10b   :  { %v108_v49 = vsub.f32 1.5, %v107_v46  ;;  %1683 = vrcp.f32 %v103_v48  ;;  %v127_v58 = vand.u32 2147483648, %v103_v48  ;;  %v125_v60 = vand.u32 2147483647, %v103_v48  ;;  %226 = vmatpush.msrb.mxu2 %v42_v43  ;;  %v40_v46 = vld [vmem:[%s2314_s3 + $0x40] sm:$0xff] }
 0x10c   :  { %vm121_vm7 = vweird.f32 %v103_v48 }
 0x10d   :  { %v109_v50 = vmul.f32 %v1682_v40, %v108_v49  ;;  %v128_v63 = vor.u32 1.1754944e-38, %v127_v58  ;;  %vm126_vm9 = vcmp.eq.f32.partialorder %v125_v60, 8.507059e+37  ;;  %227 = vmatpush.msrb.mxu2 %v41_v45  ;;  %v1912_v49 = vld [vmem:[%s2315_s2] sm:$0xff] }
 0x10f   :  { %v110_v52 = vmul.f32 %v109_v50, %v91_v35  ;;  %v282_v39 = vld [vmem:[#allocation3 + $0x10] sm:$0xff]  ;;  %228 = vmatpush.msrb.mxu2 %v40_v46 }
 0x110   :  { %1570 = vmatpush.xpose.msk.msrb.mxu0 %vm236_vm14, %v282_v39 }
 0x111   :  { %v1684_v53 = vpop.eup %1683  ;;  %v112_v54 = vsel %vm111_vm4, %v91_v35, %v110_v52 }
 0x112   :  { %v117_v55 = vmul.f32 %v1684_v53, %v103_v48  ;;  %v115_v56 = vsel %vm113_vm5, %v114_v51, %v112_v54  ;;  %vm122_vm6 = vweird.f32 %v1684_v53 }
 0x113   :  { %1685 = vrcp.f32 %v115_v56  ;;  %vm123_vm8 = vmor %vm121_vm7, %vm122_vm6  ;;  %vm136_vm10 = vweird.f32 %v115_v56  ;;  %v142_v6 = vand.u32 2147483648, %v115_v56  ;;  %v140_v11 = vand.u32 2147483647, %v115_v56 }
 0x114   :  { %v118_v57 = vsub.f32 1.0, %v117_v55 }
 0x115   :  { %v143_v15 = vor.u32 1.1754944e-38, %v142_v6  ;;  %vm141_vm13 = vcmp.eq.f32.partialorder %v140_v11, 8.507059e+37 }
 0x116   :  { %v119_v59 = vmul.f32 %v1684_v53, %v118_v57 }
 0x118   :  { %v120_v61 = vadd.f32 %v1684_v53, %v119_v59 }
 0x119   :  { %v1686_v62 = vpop.eup %1685 }
 0x11a   :  { %v124_v1 = vsel %vm123_vm8, %v1684_v53, %v120_v61  ;;  %v132_v4 = vmul.f32 %v1686_v62, %v115_v56  ;;  %vm137_vm11 = vweird.f32 %v1686_v62 }
 0x11b   :  { %v129_v5 = vsel %vm126_vm9, %v128_v63, %v124_v1  ;;  %vm138_vm12 = vmor %vm136_vm10, %vm137_vm11 }
 0x11c   :  { %v130_v7 = vmul.f32 %v129_v5, %v1811_v13  ;;  %v133_v9 = vsub.f32 1.0, %v132_v4 }
 0x11e   :  { %v147_v12 = vmul.f32 %v1655_v3, %v130_v7  ;;  %v134_v14 = vmul.f32 %v1686_v62, %v133_v9 }
 0x120   :  { %v1860_v16 = vadd.f32 %v1656_v8, %v147_v12  ;;  %v135_v17 = vadd.f32 %v1686_v62, %v134_v14 }
 0x122   :  { %1559 = vmatmul.msk.f32.vlgmr.msra.gmra.mxu0 %vm62_vm0, %v1860_v16  ;;  %v139_v19 = vsel %vm138_vm12, %v1686_v62, %v135_v17 }
 0x123   :  { %v144_v13 = vsel %vm141_vm13, %v143_v15, %v139_v19  ;;  %v1659_v15 = vld [vmem:[%s2313_s4 + $0x4] ss:$0 sm:$0xff] }
 0x124   :  { %v145_v20 = vmul.f32 %v144_v13, %v1818_v18  ;;  %v281_v18 = vld [vmem:[#allocation3 + $0x8] sm:$0xff] }
 0x125   :  { %1565 = vmatpush.xpose.msk.msrb.mxu3 %vm236_vm14, %v281_v18 }
 0x126   :  { %v148_v21 = vmul.f32 %v1655_v3, %v145_v20 }
 0x128   :  { %v1865_v22 = vadd.f32 %v1656_v8, %v148_v21 }
 0x129   :  { %1566 = vmatpush.xpose.msk.msrb.mxu3 %vm236_vm14, %v280_v28 }
 0x12a   :  { %1560 = vmatmul.msk.f32.vlgmr.msra.gmra.mxu2 %vm62_vm0, %v1865_v22 }
 0x132   :  { %1563 = vmatmul.msk.f32.vlgmr.msrb.gmra.mxu2 %vm62_vm0, %v1796_v0  ;;  %v1921_v0 = vld [vmem:[%s2315_s2 + $0x8] sm:$0xff] }
 0x13a   :  { %1564 = vmatmul.msk.f32.gmra.mxu2 %vm62_vm0, %v1803_v2 }
 0x19f   :  { %v176_v30 = vpop.f32.mrf.mxu0 }
 0x1a0   :  { %v177_v31 = vadd.f32 %v1658_v29, %v176_v30 }
 0x1a2   :  { %237 = vst.msk [vmem:[#allocation2] sm:$0xff] %vm236_vm14, %v177_v31  ;;  %245 = vrot.lane.b32.xlu0 %v177_v31, %s1752_s26 }
 0x1a9   :  { %v276_v32 = vld [vmem:[#allocation2] sm:$0xff] }
 0x1aa   :  { %1567 = vmatmul.msk.f32.vlgmr.msrb.gmra.mxu3 %vm236_vm14, %v276_v32 }
 0x1ad   :  { %v179_v33 = vpop.f32.mrf.mxu2 }
 0x1ae   :  { %v180_v34 = vadd.f32 %v1658_v29, %v179_v33 }
 0x1b0   :  { %238 = vst.msk [vmem:[#allocation2 + $0x8] sm:$0xff] %vm236_vm14, %v180_v34  ;;  %247 = vrot.lane.b32.xlu1 %v180_v34, %s1752_s26 }
 0x1b5   :  { %v230_v14 = vpop.f32.mrf.mxu2 }
 0x1b6   :  { %v231_v17 = vadd.f32 %v1659_v15, %v230_v14 }
 0x1b7   :  { %v277_v35 = vld [vmem:[#allocation2 + $0x8] sm:$0xff] }
 0x1b8   :  { %1568 = vmatmul.msk.f32.gmra.mxu3 %vm236_vm14, %v277_v35  ;;  %241 = vst.msk [vmem:[#allocation4] sm:$0xff] %vm236_vm14, %v231_v17 }
 0x1bd   :  { %v233_v19 = vpop.f32.mrf.mxu2 }
 0x1be   :  { %v234_v13 = vadd.f32 %v1659_v15, %v233_v19  ;;  %v555_v15 = vld [vmem:[%s2314_s3 + $0x78] sm:$0xff] }
 0x1bf   :  { %v458_v21 = vld [vmem:[#allocation4] sm:$0xff]  ;;  %576 = vmatpush.msra.mxu0 %v555_v15 }
 0x1c0   :  { %242 = vst.msk [vmem:[#allocation4 + $0x8] sm:$0xff] %vm236_vm14, %v234_v13 }
 0x1c7   :  { %v459_v20 = vld [vmem:[#allocation4 + $0x8] sm:$0xff] }
 0x1c8   :  { %482 = vmatpush.msrb.mxu1 %v459_v20 }
 0x1ca   :  { %483 = vmatpush.msrb.mxu1 %v458_v21 }
 0x214   :  { %v246_v40 = vpop.permute.xlu0 %245 }
 0x215   :  { %252 = vst.msk [vmem:[#allocation2 + $0x10] sm:$0xff] %vm236_vm14, %v246_v40 }
 0x21c   :  { %v278_v41 = vld [vmem:[#allocation2 + $0x10] sm:$0xff] }
 0x21d   :  { %1571 = vmatmul.msk.f32.vlgmr.msrb.gmra.mxu0 %vm236_vm14, %v278_v41 }
 0x222   :  { %v248_v44 = vpop.permute.xlu1 %247 }
 0x223   :  { %253 = vst.msk [vmem:[#allocation2 + $0x18] sm:$0xff] %vm236_vm14, %v248_v44 }
 0x22a   :  { %v279_v47 = vld [vmem:[#allocation2 + $0x18] sm:$0xff] }
 0x22b   :  { %1572 = vmatmul.msk.f32.gmra.mxu0 %vm236_vm14, %v279_v47 }
 0x22d   :  { %v313_v48 = vpop.f32.mrf.mxu3 }
 0x22e   :  { %v354_v50 = vmul.f32 0.25, %v313_v48 }
 0x230   :  { %v358_v51 = vadd.f32 %v354_v50, %v1912_v49 }
 0x232   :  { %v362_v52 = vsel %vm236_vm14, %v358_v51, -inf }
 0x233   :  { %363 = vmax.xlane.f32.xlu2 %v362_v52 }
 0x23b   :  { %v316_v53 = vpop.f32.mrf.mxu3 }
 0x23c   :  { %v355_v54 = vmul.f32 0.25, %v316_v53 }
 0x23e   :  { %v359_v55 = vadd.f32 %v355_v54, %v1921_v0 }
 0x240   :  { %v365_v56 = vsel %vm236_vm14, %v359_v55, -inf }
 0x241   :  { %366 = vmax.xlane.f32.xlu1 %v365_v56 }
 0x25a   :  { %269 = vrot.lane.b32.xlu1 %v234_v13, %s1752_s26 }
 0x29a   :  { %v348_v57 = vpop.f32.mrf.mxu0 }
 0x29b   :  { %v356_v58 = vmul.f32 0.25, %v348_v57 }
 0x29d   :  { %v360_v59 = vadd.f32 %v356_v58, %v1912_v49 }
 0x29f   :  { %v368_v2 = vsel %vm236_vm14, %v360_v59, -inf }
 0x2a0   :  { %369 = vmax.xlane.f32.xlu0 %v368_v2 }
 0x2a6   :  { %v364_v60 = vpop.xlane.xlu2 %363 }
 0x2a7   :  { %v374_v61 = vsub.f32 %v358_v51, %v364_v60 }
 0x2a8   :  { %v351_v62 = vpop.f32.mrf.mxu0 }
 0x2a9   :  { %v378_v63 = vmul.f32 1.442695, %v374_v61  ;;  %v357_v1 = vmul.f32 0.25, %v351_v62  ;;  %v521_v61 = vld [vmem:[%s2314_s3 + $0x68] sm:$0xff] }
 0x2aa   :  { %542 = vmatpush.msra.mxu3 %v521_v61 }
 0x2ab   :  { %v361_v3 = vadd.f32 %v357_v1, %v1921_v0  ;;  %1687 = vpow2.f32 %v378_v63  ;;  %v520_v63 = vld [vmem:[%s2314_s3 + $0x60] sm:$0xff] }
 0x2ac   :  { %543 = vmatpush.msra.mxu3 %v520_v63 }
 0x2ad   :  { %v371_v4 = vsel %vm236_vm14, %v361_v3, -inf }
 0x2ae   :  { %372 = vmax.xlane.f32.xlu2 %v371_v4 }
 0x2b1   :  { %v1688_v5 = vpop.eup %1687 }
 0x2b2   :  { %v386_v8 = vsel %vm236_vm14, %v1688_v5, 0.0 }
 0x2b4   :  { %v367_v6 = vpop.xlane.xlu1 %366 }
 0x2b5   :  { %v375_v7 = vsub.f32 %v359_v55, %v367_v6 }
 0x2b6   :  { %387 = vadd.xlane.f32.xlu2 %v386_v8 }
 0x2b7   :  { %v380_v9 = vmul.f32 1.442695, %v375_v7 }
 0x2b9   :  { %1689 = vpow2.f32 %v380_v9 }
 0x2bf   :  { %v1930_v11 = vpop.eup %1689 }
 0x2c0   :  { %v389_v12 = vsel %vm236_vm14, %v1930_v11, 0.0 }
 0x2c1   :  { %390 = vadd.xlane.f32.xlu0 %v389_v12 }
 0x2cc   :  { %v270_v58 = vpop.permute.xlu1 %269 }
 0x2cd   :  { %275 = vst.msk [vmem:[#allocation4 + $0x18] sm:$0xff] %vm236_vm14, %v270_v58 }
 0x2d5   :  { %267 = vrot.lane.b32.xlu0 %v231_v17, %s1752_s26 }
 0x313   :  { %v370_v23 = vpop.xlane.xlu0 %369 }
 0x314   :  { %v376_v24 = vsub.f32 %v360_v59, %v370_v23  ;;  %v461_v59 = vld [vmem:[#allocation4 + $0x18] sm:$0xff] }
 0x315   :  { %511 = vmatpush.msra.mxu2 %v461_v59  ;;  %v45_v59 = vld [vmem:[%s2314_s3 + $0x88] sm:$0xff] }
 0x316   :  { %v382_v25 = vmul.f32 1.442695, %v376_v24 }
 0x318   :  { %1691 = vpow2.f32 %v382_v25 }
 0x31e   :  { %v1941_v26 = vpop.eup %1691 }
 0x31f   :  { %v392_v27 = vsel %vm236_vm14, %v1941_v26, 0.0 }
 0x320   :  { %393 = vadd.xlane.f32.xlu2 %v392_v27 }
 0x321   :  { %v373_v18 = vpop.xlane.xlu2 %372 }
 0x322   :  { %v377_v28 = vsub.f32 %v361_v3, %v373_v18 }
 0x324   :  { %v384_v29 = vmul.f32 1.442695, %v377_v28 }
 0x326   :  { %1693 = vpow2.f32 %v384_v29 }
 0x329   :  { %v388_v30 = vpop.xlane.xlu2 %387 }
 0x32a   :  { %1695 = vrcp.f32 %v388_v30  ;;  %v409_v36 = vand.u32 2147483648, %v388_v30  ;;  %v407_v39 = vand.u32 2147483647, %v388_v30  ;;  %vm403_vm1 = vweird.f32 %v388_v30 }
 0x32c   :  { %v1945_v31 = vpop.eup %1693  ;;  %v410_v41 = vor.u32 1.1754944e-38, %v409_v36  ;;  %vm408_vm3 = vcmp.eq.f32.partialorder %v407_v39, 8.507059e+37 }
 0x32d   :  { %v395_v32 = vsel %vm236_vm14, %v1945_v31, 0.0 }
 0x32e   :  { %396 = vadd.xlane.f32.xlu2 %v395_v32 }
 0x330   :  { %v1696_v33 = vpop.eup %1695 }
 0x331   :  { %v399_v34 = vmul.f32 %v1696_v33, %v388_v30  ;;  %vm404_vm15 = vweird.f32 %v1696_v33  ;;  %v554_v30 = vld [vmem:[%s2314_s3 + $0x70] sm:$0xff] }
 0x332   :  { %vm405_vm2 = vmor %vm403_vm1, %vm404_vm15  ;;  %577 = vmatpush.msra.mxu0 %v554_v30 }
 0x333   :  { %v400_v35 = vsub.f32 1.0, %v399_v34 }
 0x334   :  { %v391_v37 = vpop.xlane.xlu0 %390 }
 0x335   :  { %v401_v38 = vmul.f32 %v1696_v33, %v400_v35  ;;  %1697 = vrcp.f32 %v391_v37  ;;  %v424_v48 = vand.u32 2147483648, %v391_v37  ;;  %v422_v51 = vand.u32 2147483647, %v391_v37 }
 0x336   :  { %vm418_vm5 = vweird.f32 %v391_v37 }
 0x337   :  { %v402_v40 = vadd.f32 %v1696_v33, %v401_v38  ;;  %v425_v53 = vor.u32 1.1754944e-38, %v424_v48  ;;  %vm423_vm7 = vcmp.eq.f32.partialorder %v422_v51, 8.507059e+37 }
 0x339   :  { %v406_v42 = vsel %vm405_vm2, %v1696_v33, %v402_v40 }
 0x33a   :  { %v411_v43 = vsel %vm408_vm3, %v410_v41, %v406_v42 }
 0x33b   :  { %v1698_v44 = vpop.eup %1697  ;;  %v412_v45 = vmul.f32 %v1688_v5, %v411_v43 }
 0x33c   :  { %v414_v46 = vmul.f32 %v1698_v44, %v391_v37  ;;  %vm419_vm4 = vweird.f32 %v1698_v44 }
 0x33d   :  { %1573 = vmatmul.msk.f32.vlgmr.msrb.gmra.mxu1 %vm236_vm14, %v412_v45  ;;  %vm420_vm6 = vmor %vm418_vm5, %vm419_vm4 }
 0x33e   :  { %v415_v47 = vsub.f32 1.0, %v414_v46 }
 0x340   :  { %v416_v50 = vmul.f32 %v1698_v44, %v415_v47 }
 0x342   :  { %v417_v52 = vadd.f32 %v1698_v44, %v416_v50 }
 0x344   :  { %v421_v54 = vsel %vm420_vm6, %v1698_v44, %v417_v52 }
 0x345   :  { %v426_v55 = vsel %vm423_vm7, %v425_v53, %v421_v54 }
 0x346   :  { %v427_v56 = vmul.f32 %v1930_v11, %v426_v55 }
 0x347   :  { %v268_v57 = vpop.permute.xlu0 %267 }
 0x348   :  { %1574 = vmatmul.msk.f32.gmra.mxu1 %vm236_vm14, %v427_v56  ;;  %274 = vst.msk [vmem:[#allocation4 + $0x10] sm:$0xff] %vm236_vm14, %v268_v57  ;;  %v47_v56 = vld [vmem:[%s2314_s3 + $0x98] sm:$0xff]  ;;  %v46_v57 = vld [vmem:[%s2314_s3 + $0x90] sm:$0xff] }
 0x349   :  { %690 = vmatpush.msra.mxu1 %v47_v56  ;;  %v48_v56 = vld [vmem:[%s2314_s3 + $0xa0] sm:$0xff] }
 0x34b   :  { %691 = vmatpush.msra.mxu1 %v46_v57 }
 0x34d   :  { %692 = vmatpush.msra.mxu1 %v45_v59 }
 0x34f   :  { %v460_v2 = vld [vmem:[#allocation4 + $0x10] sm:$0xff] }
 0x350   :  { %512 = vmatpush.msra.mxu2 %v460_v2 }
 0x393   :  { %v394_v60 = vpop.xlane.xlu2 %393 }
 0x394   :  { %1699 = vrcp.f32 %v394_v60  ;;  %v439_v4 = vand.u32 2147483648, %v394_v60  ;;  %v437_v6 = vand.u32 2147483647, %v394_v60  ;;  %vm433_vm9 = vweird.f32 %v394_v60 }
 0x396   :  { %v440_v9 = vor.u32 1.1754944e-38, %v439_v4  ;;  %vm438_vm11 = vcmp.eq.f32.partialorder %v437_v6, 8.507059e+37 }
 0x39a   :  { %v1700_v62 = vpop.eup %1699 }
 0x39b   :  { %v429_v1 = vmul.f32 %v1700_v62, %v394_v60  ;;  %vm434_vm8 = vweird.f32 %v1700_v62  ;;  %v44_v60 = vld [vmem:[%s2314_s3 + $0x80] sm:$0xff] }
 0x39c   :  { %vm435_vm10 = vmor %vm433_vm9, %vm434_vm8  ;;  %693 = vmatpush.msra.mxu1 %v44_v60 }
 0x39d   :  { %v430_v3 = vsub.f32 1.0, %v429_v1 }
 0x39f   :  { %v431_v5 = vmul.f32 %v1700_v62, %v430_v3 }
 0x3a1   :  { %v432_v7 = vadd.f32 %v1700_v62, %v431_v5  ;;  %v397_v8 = vpop.xlane.xlu2 %396 }
 0x3a2   :  { %1701 = vrcp.f32 %v397_v8  ;;  %v454_v20 = vand.u32 2147483648, %v397_v8  ;;  %v452_v23 = vand.u32 2147483647, %v397_v8  ;;  %vm448_vm13 = vweird.f32 %v397_v8 }
 0x3a3   :  { %v436_v11 = vsel %vm435_vm10, %v1700_v62, %v432_v7 }
 0x3a4   :  { %v441_v12 = vsel %vm438_vm11, %v440_v9, %v436_v11  ;;  %v455_v25 = vor.u32 1.1754944e-38, %v454_v20  ;;  %vm453_vm1 = vcmp.eq.f32.partialorder %v452_v23, 8.507059e+37 }
 0x3a5   :  { %v442_v14 = vmul.f32 %v1941_v26, %v441_v12 }
 0x3a7   :  { %1575 = vmatmul.msk.f32.vlgmr.msra.gmra.mxu2 %vm236_vm14, %v442_v14 }
 0x3a8   :  { %v1702_v17 = vpop.eup %1701 }
 0x3a9   :  { %v444_v19 = vmul.f32 %v1702_v17, %v397_v8  ;;  %vm449_vm12 = vweird.f32 %v1702_v17 }
 0x3aa   :  { %vm450_vm15 = vmor %vm448_vm13, %vm449_vm12 }
 0x3ab   :  { %v445_v13 = vsub.f32 1.0, %v444_v19 }
 0x3ad   :  { %v446_v21 = vmul.f32 %v1702_v17, %v445_v13  ;;  %v51_v13 = vld [vmem:[%s2314_s3 + $0xb8] sm:$0xff] }
 0x3ae   :  { %722 = vmatpush.msrb.mxu2 %v51_v13 }
 0x3af   :  { %v447_v24 = vadd.f32 %v1702_v17, %v446_v21 }
 0x3b1   :  { %v451_v27 = vsel %vm450_vm15, %v1702_v17, %v447_v24 }
 0x3b2   :  { %v456_v26 = vsel %vm453_vm1, %v455_v25, %v451_v27 }
 0x3b3   :  { %v457_v18 = vmul.f32 %v1945_v31, %v456_v26  ;;  %v1660_v31 = vld [vmem:[%s2313_s4 + $0x5] ss:$0 sm:$0xff] }
 0x3b5   :  { %1576 = vmatmul.msk.f32.gmra.mxu2 %vm236_vm14, %v457_v18 }
 0x3ba   :  { %v485_v28 = vpop.f32.mrf.mxu1 }
 0x3bb   :  { %1577 = vmatmul.msk.f32.vlgmr.msra.gmra.mxu3 %vm236_vm14, %v485_v28 }
 0x3c5   :  { %v488_v29 = vpop.f32.mrf.mxu1 }
 0x3c6   :  { %1578 = vmatmul.msk.f32.gmra.mxu3 %vm236_vm14, %v488_v29 }
 0x42a   :  { %v514_v32 = vpop.f32.mrf.mxu2 }
 0x42b   :  { %1579 = vmatmul.msk.f32.vlgmr.msra.gmra.mxu0 %vm236_vm14, %v514_v32 }
 0x438   :  { %v517_v33 = vpop.f32.mrf.mxu2 }
 0x439   :  { %1580 = vmatmul.msk.f32.gmra.mxu0 %vm236_vm14, %v517_v33 }
 0x43e   :  { %v545_v34 = vpop.f32.mrf.mxu3 }
 0x43f   :  { %v552_v35 = vadd.f32 %v1660_v31, %v545_v34 }
 0x449   :  { %v548_v40 = vpop.f32.mrf.mxu3 }
 0x44a   :  { %v553_v41 = vadd.f32 %v1660_v31, %v548_v40 }
 0x4a8   :  { %v579_v36 = vpop.f32.mrf.mxu0 }
 0x4a9   :  { %v585_v37 = vadd.f32 %v579_v36, %v552_v35  ;;  %v1661_v35 = vld [vmem:[%s2313_s4 + $0x6] ss:$0 sm:$0xff] }
 0x4ab   :  { %v587_v38 = vadd.f32 %v585_v37, %v1860_v16 }
 0x4ad   :  { %v589_v39 = vsel %vm62_vm0, %v587_v38, 0.0 }
 0x4ae   :  { %590 = vadd.xlane.f32.xlu2 %v589_v39 }
 0x4b6   :  { %v582_v42 = vpop.f32.mrf.mxu0 }
 0x4b7   :  { %v586_v43 = vadd.f32 %v582_v42, %v553_v41 }
 0x4b9   :  { %v588_v44 = vadd.f32 %v586_v43, %v1865_v22 }
 0x4bb   :  { %v592_v45 = vsel %vm62_vm0, %v588_v44, 0.0 }
 0x4bc   :  { %593 = vadd.xlane.f32.xlu2 %v592_v45 }
 0x521   :  { %v591_v46 = vpop.xlane.xlu2 %590 }
 0x522   :  { %v595_v47 = vmul.f32 %v591_v46, %v1807_v10 }
 0x524   :  { %v1982_v48 = vsub.f32 %v587_v38, %v595_v47  ;;  %v1662_v38 = vld [vmem:[%s2313_s4 + $0x7] ss:$0 sm:$0xff] }
 0x526   :  { %v599_v16 = vmul.f32 %v1982_v48, %v1982_v48 }
 0x528   :  { %v601_v50 = vsel %vm62_vm0, %v599_v16, 0.0 }
 0x529   :  { %602 = vadd.xlane.f32.xlu2 %v601_v50 }
 0x52f   :  { %v594_v51 = vpop.xlane.xlu2 %593 }
 0x530   :  { %v596_v52 = vmul.f32 %v594_v51, %v1807_v10 }
 0x532   :  { %v1988_v53 = vsub.f32 %v588_v44, %v596_v52 }
 0x534   :  { %v600_v22 = vmul.f32 %v1988_v53, %v1988_v53 }
 0x536   :  { %v604_v54 = vsel %vm62_vm0, %v600_v22, 0.0 }
 0x537   :  { %605 = vadd.xlane.f32.xlu0 %v604_v54  ;;  %v50_v54 = vld [vmem:[%s2314_s3 + $0xb0] sm:$0xff] }
 0x538   :  { %723 = vmatpush.msrb.mxu2 %v50_v54 }
 0x59c   :  { %v603_v55 = vpop.xlane.xlu2 %602 }
 0x59d   :  { %v607_v58 = vmul.f32 %v603_v55, %v1807_v10  ;;  %v49_v55 = vld [vmem:[%s2314_s3 + $0xa8] sm:$0xff] }
 0x59e   :  { %724 = vmatpush.msrb.mxu2 %v49_v55 }
 0x59f   :  { %v609_v2 = vadd.f32 1e-08, %v607_v58 }
 0x5a0   :  { %725 = vmatpush.msrb.mxu2 %v48_v56 }
 0x5a1   :  { %1703 = vrsqrt.f32 %v609_v2  ;;  %vm618_vm2 = vcmp.eq.f32.partialorder %v609_v2, inf  ;;  %v621_v9 = vand.u32 2147483648, %v609_v2  ;;  %vm620_vm3 = vcmp.eq.f32.partialorder %v609_v2, 0.0 }
 0x5a7   :  { %v1704_v61 = vpop.eup %1703 }
 0x5a8   :  { %v612_v62 = vmul.f32 %v1704_v61, %v609_v2 }
 0x5aa   :  { %v613_v63 = vmul.f32 %v1704_v61, %v612_v62  ;;  %v606_v1 = vpop.xlane.xlu0 %605  ;;  %v1592_v62 = vld [vmem:[%s2314_s3 + $0xf8] sm:$0xff] }
 0x5ab   :  { %v608_v3 = vmul.f32 %v606_v1, %v1807_v10  ;;  %900 = vmatpush.msrb.mxu0 %v1592_v62  ;;  %v1591_v1 = vld [vmem:[%s2314_s3 + $0xf0] sm:$0xff] }
 0x5ac   :  { %v614_v4 = vmul.f32 0.5, %v613_v63  ;;  %v1596_v63 = vld [vmem:[%s2314_s3 + $0x118] sm:$0xff] }
 0x5ad   :  { %v610_v5 = vadd.f32 1e-08, %v608_v3  ;;  %924 = vmatpush.msrb.mxu1 %v1596_v63  ;;  %v1595_v3 = vld [vmem:[%s2314_s3 + $0x110] sm:$0xff]  ;;  %901 = vmatpush.msrb.mxu0 %v1591_v1 }
 0x5ae   :  { %v615_v6 = vsub.f32 1.5, %v614_v4  ;;  %v1590_v4 = vld [vmem:[%s2314_s3 + $0xe8] sm:$0xff] }
 0x5af   :  { %1705 = vrsqrt.f32 %v610_v5  ;;  %vm630_vm4 = vcmp.eq.f32.partialorder %v610_v5, inf  ;;  %v633_v29 = vand.u32 2147483648, %v610_v5  ;;  %vm632_vm6 = vcmp.eq.f32.partialorder %v610_v5, 0.0  ;;  %925 = vmatpush.msrb.mxu1 %v1595_v3  ;;  %902 = vmatpush.msrb.mxu0 %v1590_v4 }
 0x5b0   :  { %v616_v7 = vmul.f32 %v1704_v61, %v615_v6  ;;  %v1589_v6 = vld [vmem:[%s2314_s3 + $0xe0] sm:$0xff] }
 0x5b1   :  { %903 = vmatpush.msrb.mxu0 %v1589_v6 }
 0x5b2   :  { %v617_v8 = vmul.f32 %v616_v7, %v609_v2  ;;  %v1593_v7 = vld [vmem:[%s2314_s3 + $0x100] sm:$0xff] }
 0x5b4   :  { %v619_v11 = vsel %vm618_vm2, %v609_v2, %v617_v8  ;;  %v1664_v8 = vld [vmem:[%s2313_s4 + $0x9] ss:$0 sm:$0xff] }
 0x5b5   :  { %v1706_v12 = vpop.eup %1705  ;;  %v622_v14 = vsel %vm620_vm3, %v621_v9, %v619_v11 }
 0x5b6   :  { %v624_v15 = vmul.f32 %v1706_v12, %v610_v5  ;;  %1707 = vrcp.f32 %v622_v14  ;;  %v646_v27 = vand.u32 2147483648, %v622_v14  ;;  %v644_v28 = vand.u32 2147483647, %v622_v14 }
 0x5b7   :  { %vm640_vm7 = vweird.f32 %v622_v14 }
 0x5b8   :  { %v625_v17 = vmul.f32 %v1706_v12, %v624_v15  ;;  %v647_v31 = vor.u32 1.1754944e-38, %v646_v27  ;;  %vm645_vm9 = vcmp.eq.f32.partialorder %v644_v28, 8.507059e+37  ;;  %v1665_v28 = vld [vmem:[%s2313_s4 + $0x13] ss:$0 sm:$0xff] }
 0x5ba   :  { %v626_v19 = vmul.f32 0.5, %v625_v17 }
 0x5bc   :  { %v1708_v20 = vpop.eup %1707  ;;  %v627_v21 = vsub.f32 1.5, %v626_v19 }
 0x5bd   :  { %v636_v23 = vmul.f32 %v1708_v20, %v622_v14  ;;  %vm641_vm5 = vweird.f32 %v1708_v20 }
 0x5be   :  { %v628_v24 = vmul.f32 %v1706_v12, %v627_v21  ;;  %vm642_vm8 = vmor %vm640_vm7, %vm641_vm5  ;;  %v2064_v12 = vld [vmem:[%s2316_s1] sm:$0xff] }
 0x5bf   :  { %v637_v25 = vsub.f32 1.0, %v636_v23 }
 0x5c0   :  { %v629_v26 = vmul.f32 %v628_v24, %v610_v5 }
 0x5c1   :  { %v638_v18 = vmul.f32 %v1708_v20, %v637_v25 }
 0x5c2   :  { %v631_v30 = vsel %vm630_vm4, %v610_v5, %v629_v26  ;;  %v1594_v5 = vld [vmem:[%s2314_s3 + $0x108] sm:$0xff] }
 0x5c3   :  { %v639_v32 = vadd.f32 %v1708_v20, %v638_v18  ;;  %v634_v33 = vsel %vm632_vm6, %v633_v29, %v631_v30  ;;  %926 = vmatpush.msrb.mxu1 %v1594_v5  ;;  %v1666_v29 = vld [vmem:[%s2313_s4 + $0x14] ss:$0 sm:$0xff] }
 0x5c4   :  { %1709 = vrcp.f32 %v634_v33  ;;  %v661_v44 = vand.u32 2147483648, %v634_v33  ;;  %v659_v46 = vand.u32 2147483647, %v634_v33  ;;  %vm655_vm11 = vweird.f32 %v634_v33 }
 0x5c5   :  { %v643_v34 = vsel %vm642_vm8, %v1708_v20, %v639_v32  ;;  %927 = vmatpush.msrb.mxu1 %v1593_v7  ;;  %v2073_v20 = vld [vmem:[%s2316_s1 + $0x8] sm:$0xff] }
 0x5c6   :  { %v648_v36 = vsel %vm645_vm9, %v647_v31, %v643_v34  ;;  %v662_v16 = vor.u32 1.1754944e-38, %v661_v44  ;;  %vm660_vm13 = vcmp.eq.f32.partialorder %v659_v46, 8.507059e+37 }
 0x5c7   :  { %v649_v37 = vmul.f32 %v648_v36, %v1982_v48 }
 0x5c9   :  { %v666_v39 = vmul.f32 %v1661_v35, %v649_v37 }
 0x5ca   :  { %v1710_v40 = vpop.eup %1709 }
 0x5cb   :  { %v669_v41 = vadd.f32 %v1662_v38, %v666_v39  ;;  %v651_v42 = vmul.f32 %v1710_v40, %v634_v33  ;;  %vm656_vm10 = vweird.f32 %v1710_v40 }
 0x5cc   :  { %vm657_vm12 = vmor %vm655_vm11, %vm656_vm10 }
 0x5cd   :  { %1581 = vmatmul.msk.f32.vlgmr.msra.gmra.mxu1 %vm62_vm0, %v669_v41  ;;  %v652_v43 = vsub.f32 1.0, %v651_v42 }
 0x5cf   :  { %v653_v45 = vmul.f32 %v1710_v40, %v652_v43 }
 0x5d1   :  { %v654_v47 = vadd.f32 %v1710_v40, %v653_v45 }
 0x5d3   :  { %v658_v48 = vsel %vm657_vm12, %v1710_v40, %v654_v47 }
 0x5d4   :  { %v663_v50 = vsel %vm660_vm13, %v662_v16, %v658_v48  ;;  %v1588_v16 = vld [vmem:[%s2314_s3 + $0xd8] sm:$0xff]  ;;  %v1587_v48 = vld [vmem:[%s2314_s3 + $0xd0] sm:$0xff] }
 0x5d5   :  { %v664_v51 = vmul.f32 %v663_v50, %v1988_v53  ;;  %v1663_v53 = vld [vmem:[%s2313_s4 + $0x8] ss:$0 sm:$0xff]  ;;  %870 = vmatpush.msrb.mxu3 %v1588_v16 }
 0x5d6   :  { %v1586_v50 = vld [vmem:[%s2314_s3 + $0xc8] sm:$0xff] }
 0x5d7   :  { %v667_v52 = vmul.f32 %v1661_v35, %v664_v51  ;;  %871 = vmatpush.msrb.mxu3 %v1587_v48  ;;  %v1585_v51 = vld [vmem:[%s2314_s3 + $0xc0] sm:$0xff] }
 0x5d9   :  { %v670_v22 = vadd.f32 %v1662_v38, %v667_v52  ;;  %872 = vmatpush.msrb.mxu3 %v1586_v50 }
 0x5db   :  { %1582 = vmatmul.msk.f32.gmra.mxu1 %vm62_vm0, %v670_v22  ;;  %873 = vmatpush.msrb.mxu3 %v1585_v51 }
 0x64a   :  { %v695_v57 = vpop.f32.mrf.mxu1 }
 0x64b   :  { %v696_v58 = vadd.f32 %v1663_v53, %v695_v57 }
 0x64d   :  { %v701_v59 = vmax.f32 %v696_v58, 0.0 }
 0x64f   :  { %1583 = vmatmul.msk.f32.vlgmr.msrb.gmra.mxu2 %vm62_vm0, %v701_v59 }
 0x658   :  { %v698_v2 = vpop.f32.mrf.mxu1 }
 0x659   :  { %v699_v60 = vadd.f32 %v1663_v53, %v698_v2 }
 0x65b   :  { %v702_v61 = vmax.f32 %v699_v60, 0.0 }
 0x65d   :  { %1584 = vmatmul.msk.f32.gmra.mxu2 %vm62_vm0, %v702_v61 }
 0x6d2   :  { %v727_v9 = vpop.f32.mrf.mxu2 }
 0x6d3   :  { %v728_v11 = vadd.f32 %v1664_v8, %v727_v9 }
 0x6d5   :  { %v733_v14 = vadd.f32 %v728_v11, %v669_v41 }
 0x6d7   :  { %v735_v15 = vmul.f32 %v733_v14, %v2064_v12 }
 0x6d9   :  { %1617 = vmatmul.msk.f32.vlgmr.msrb.gmra.mxu0 %vm62_vm0, %v735_v15  ;;  %1619 = vmatmul.msk.f32.vlgmr.msrb.gmra.mxu1 %vm62_vm0, %v735_v15  ;;  %v769_v17 = vsel %vm62_vm0, %v735_v15, 0.0 }
 0x6da   :  { %770 = vadd.xlane.f32.xlu1 %v769_v17 }
 0x6e0   :  { %v730_v19 = vpop.f32.mrf.mxu2 }
 0x6e1   :  { %v731_v13 = vadd.f32 %v1664_v8, %v730_v19 }
 0x6e3   :  { %v734_v21 = vadd.f32 %v731_v13, %v670_v22 }
 0x6e5   :  { %v736_v23 = vmul.f32 %v734_v21, %v2073_v20 }
 0x6e7   :  { %1618 = vmatmul.msk.f32.gmra.mxu0 %vm62_vm0, %v736_v23  ;;  %1620 = vmatmul.msk.f32.gmra.mxu1 %vm62_vm0, %v736_v23  ;;  %v772_v24 = vsel %vm62_vm0, %v736_v23, 0.0 }
 0x6e8   :  { %773 = vadd.xlane.f32.xlu2 %v772_v24 }
 0x74d   :  { %v771_v25 = vpop.xlane.xlu1 %770 }
 0x74e   :  { %v775_v27 = vmul.f32 %v771_v25, %v1807_v10 }
 0x750   :  { %v2080_v26 = vsub.f32 %v735_v15, %v775_v27 }
 0x752   :  { %v779_v18 = vmul.f32 %v2080_v26, %v2080_v26 }
 0x754   :  { %v781_v30 = vsel %vm62_vm0, %v779_v18, 0.0 }
 0x755   :  { %782 = vadd.xlane.f32.xlu2 %v781_v30 }
 0x756   :  { %v905_v32 = vpop.f32.mrf.mxu0  ;;  %v929_v33 = vpop.f32.mrf.mxu1 }
 0x757   :  { %v906_v31 = vadd.f32 %v1665_v28, %v905_v32  ;;  %v2091_v34 = vadd.f32 %v1666_v29, %v929_v33 }
 0x759   :  { %937 = vst.msk [vmem:[#allocation3] sm:$0xff] %vm236_vm14, %v906_v31  ;;  %953 = vrot.lane.b32.xlu0 %v906_v31, %s1752_s26  ;;  %v1667_v31 = vld [vmem:[%s2313_s4 + $0x10] ss:$0 sm:$0xff] }
 0x75a   :  { %939 = vst.msk [vmem:[#allocation4] sm:$0xff] %vm236_vm14, %v2091_v34 }
 0x75b   :  { %v774_v35 = vpop.xlane.xlu2 %773 }
 0x75c   :  { %v776_v36 = vmul.f32 %v774_v35, %v1807_v10 }
 0x75e   :  { %v2098_v37 = vsub.f32 %v736_v23, %v776_v36 }
 0x760   :  { %v780_v38 = vmul.f32 %v2098_v37, %v2098_v37  ;;  %v975_v47 = vld [vmem:[#allocation3] sm:$0xff] }
 0x761   :  { %v1153_v46 = vld [vmem:[#allocation4] sm:$0xff] }
 0x762   :  { %v784_v39 = vsel %vm62_vm0, %v780_v38, 0.0  ;;  %v1668_v38 = vld [vmem:[%s2313_s4 + $0x11] ss:$0 sm:$0xff] }
 0x763   :  { %785 = vadd.xlane.f32.xlu2 %v784_v39 }
 0x764   :  { %v908_v40 = vpop.f32.mrf.mxu0  ;;  %v932_v41 = vpop.f32.mrf.mxu1 }
 0x765   :  { %v909_v42 = vadd.f32 %v1665_v28, %v908_v40  ;;  %v2103_v43 = vadd.f32 %v1666_v29, %v932_v41 }
 0x767   :  { %938 = vst.msk [vmem:[#allocation3 + $0x8] sm:$0xff] %vm236_vm14, %v909_v42 }
 0x768   :  { %940 = vst.msk [vmem:[#allocation4 + $0x8] sm:$0xff] %vm236_vm14, %v2103_v43 }
 0x76e   :  { %v976_v44 = vld [vmem:[#allocation3 + $0x8] sm:$0xff] }
 0x76f   :  { %1621 = vmatpush.xpose.msk.msra.mxu2 %vm236_vm14, %v976_v44  ;;  %v1154_v45 = vld [vmem:[#allocation4 + $0x8] sm:$0xff] }
 0x770   :  { %1177 = vmatpush.msra.mxu0 %v1154_v45 }
 0x772   :  { %1178 = vmatpush.msra.mxu0 %v1153_v46 }
 0x773   :  { %1622 = vmatpush.xpose.msk.msra.mxu2 %vm236_vm14, %v975_v47 }
 0x77b   :  { %955 = vrot.lane.b32.xlu2 %v909_v42, %s1752_s26 }
 0x7c8   :  { %v783_v52 = vpop.xlane.xlu2 %782 }
 0x7c9   :  { %v787_v22 = vmul.f32 %v783_v52, %v1807_v10 }
 0x7cb   :  { %v789_v54 = vadd.f32 1e-08, %v787_v22  ;;  %v954_v55 = vpop.permute.xlu0 %953 }
 0x7cc   :  { %959 = vst.msk [vmem:[#allocation3 + $0x10] sm:$0xff] %vm236_vm14, %v954_v55 }
 0x7cd   :  { %1711 = vrsqrt.f32 %v789_v54  ;;  %vm798_vm15 = vcmp.eq.f32.partialorder %v789_v54, inf  ;;  %v801_v3 = vand.u32 2147483648, %v789_v54  ;;  %vm800_vm1 = vcmp.eq.f32.partialorder %v789_v54, 0.0 }
 0x7d3   :  { %v1712_v56 = vpop.eup %1711  ;;  %v977_v19 = vld [vmem:[#allocation3 + $0x10] sm:$0xff] }
 0x7d4   :  { %v792_v53 = vmul.f32 %v1712_v56, %v789_v54 }
 0x7d6   :  { %v793_v57 = vmul.f32 %v1712_v56, %v792_v53  ;;  %v786_v58 = vpop.xlane.xlu2 %785 }
 0x7d7   :  { %v788_v59 = vmul.f32 %v786_v58, %v1807_v10 }
 0x7d8   :  { %v794_v2 = vmul.f32 0.5, %v793_v57 }
 0x7d9   :  { %v790_v60 = vadd.f32 1e-08, %v788_v59 }
 0x7da   :  { %v795_v61 = vsub.f32 1.5, %v794_v2 }
 0x7db   :  { %1713 = vrsqrt.f32 %v790_v60  ;;  %vm810_vm2 = vcmp.eq.f32.partialorder %v790_v60, inf  ;;  %v813_v18 = vand.u32 2147483648, %v790_v60  ;;  %vm812_vm4 = vcmp.eq.f32.partialorder %v790_v60, 0.0 }
 0x7dc   :  { %v796_v62 = vmul.f32 %v1712_v56, %v795_v61 }
 0x7de   :  { %v797_v63 = vmul.f32 %v796_v62, %v789_v54  ;;  %v956_v1 = vpop.permute.xlu2 %955 }
 0x7df   :  { %960 = vst.msk [vmem:[#allocation3 + $0x18] sm:$0xff] %vm236_vm14, %v956_v1 }
 0x7e0   :  { %v799_v4 = vsel %vm798_vm15, %v789_v54, %v797_v63  ;;  %v1669_v54 = vld [vmem:[%s2313_s4 + $0x12] ss:$0 sm:$0xff] }
 0x7e1   :  { %v1714_v5 = vpop.eup %1713  ;;  %v802_v6 = vsel %vm800_vm1, %v801_v3, %v799_v4 }
 0x7e2   :  { %v804_v7 = vmul.f32 %v1714_v5, %v790_v60  ;;  %1715 = vrcp.f32 %v802_v6  ;;  %v826_v23 = vand.u32 2147483648, %v802_v6  ;;  %v824_v27 = vand.u32 2147483647, %v802_v6 }
 0x7e3   :  { %vm820_vm5 = vweird.f32 %v802_v6 }
 0x7e4   :  { %v805_v8 = vmul.f32 %v1714_v5, %v804_v7  ;;  %v827_v32 = vor.u32 1.1754944e-38, %v826_v23  ;;  %vm825_vm7 = vcmp.eq.f32.partialorder %v824_v27, 8.507059e+37 }
 0x7e6   :  { %v806_v9 = vmul.f32 0.5, %v805_v8  ;;  %v978_v11 = vld [vmem:[#allocation3 + $0x18] sm:$0xff] }
 0x7e7   :  { %1625 = vmatpush.xpose.msk.msra.mxu3 %vm236_vm14, %v978_v11 }
 0x7e8   :  { %v1716_v14 = vpop.eup %1715  ;;  %v807_v15 = vsub.f32 1.5, %v806_v9 }
 0x7e9   :  { %v816_v17 = vmul.f32 %v1716_v14, %v802_v6  ;;  %vm821_vm3 = vweird.f32 %v1716_v14 }
 0x7ea   :  { %v808_v13 = vmul.f32 %v1714_v5, %v807_v15  ;;  %vm822_vm6 = vmor %vm820_vm5, %vm821_vm3 }
 0x7eb   :  { %1626 = vmatpush.xpose.msk.msra.mxu3 %vm236_vm14, %v977_v19  ;;  %v817_v21 = vsub.f32 1.0, %v816_v17 }
 0x7ec   :  { %v809_v24 = vmul.f32 %v808_v13, %v790_v60 }
 0x7ed   :  { %v818_v25 = vmul.f32 %v1716_v14, %v817_v21 }
 0x7ee   :  { %v811_v28 = vsel %vm810_vm2, %v790_v60, %v809_v24 }
 0x7ef   :  { %v819_v29 = vadd.f32 %v1716_v14, %v818_v25  ;;  %v814_v30 = vsel %vm812_vm4, %v813_v18, %v811_v28 }
 0x7f0   :  { %1717 = vrcp.f32 %v814_v30  ;;  %v841_v45 = vand.u32 2147483648, %v814_v30  ;;  %v839_v47 = vand.u32 2147483647, %v814_v30  ;;  %vm835_vm9 = vweird.f32 %v814_v30 }
 0x7f1   :  { %v823_v33 = vsel %vm822_vm6, %v1716_v14, %v819_v29 }
 0x7f2   :  { %v828_v35 = vsel %vm825_vm7, %v827_v32, %v823_v33  ;;  %vm840_vm11 = vcmp.eq.f32.partialorder %v839_v47, 8.507059e+37 }
 0x7f3   :  { %v829_v36 = vmul.f32 %v828_v35, %v2080_v26  ;;  %v842_v26 = vor.u32 1.1754944e-38, %v841_v45 }
 0x7f5   :  { %v846_v39 = vmul.f32 %v1667_v31, %v829_v36 }
 0x7f6   :  { %v1718_v40 = vpop.eup %1717 }
 0x7f7   :  { %v2136_v41 = vadd.f32 %v1668_v38, %v846_v39  ;;  %v831_v42 = vmul.f32 %v1718_v40, %v814_v30  ;;  %vm836_vm8 = vweird.f32 %v1718_v40 }
 0x7f8   :  { %vm837_vm10 = vmor %vm835_vm9, %vm836_vm8 }
 0x7f9   :  { %1615 = vmatmul.msk.f32.vlgmr.msrb.gmra.mxu3 %vm62_vm0, %v2136_v41  ;;  %v832_v44 = vsub.f32 1.0, %v831_v42 }
 0x7fb   :  { %v833_v46 = vmul.f32 %v1718_v40, %v832_v44 }
 0x7fd   :  { %v834_v16 = vadd.f32 %v1718_v40, %v833_v46 }
 0x7ff   :  { %v838_v48 = vsel %vm837_vm10, %v1718_v40, %v834_v16 }
 0x800   :  { %v843_v50 = vsel %vm840_vm11, %v842_v26, %v838_v48 }
 0x801   :  { %v844_v51 = vmul.f32 %v843_v50, %v2098_v37 }
 0x803   :  { %v847_v52 = vmul.f32 %v1667_v31, %v844_v51 }
 0x805   :  { %v2141_v22 = vadd.f32 %v1668_v38, %v847_v52 }
 0x807   :  { %1616 = vmatmul.msk.f32.gmra.mxu3 %vm62_vm0, %v2141_v22 }
 0x87c   :  { %v875_v55 = vpop.f32.mrf.mxu3 }
 0x87d   :  { %v876_v56 = vadd.f32 %v1669_v54, %v875_v55 }
 0x87f   :  { %935 = vst.msk [vmem:[#allocation2] sm:$0xff] %vm236_vm14, %v876_v56  ;;  %943 = vrot.lane.b32.xlu1 %v876_v56, %s1752_s26 }
 0x886   :  { %v971_v53 = vld [vmem:[#allocation2] sm:$0xff] }
 0x887   :  { %1623 = vmatmul.msk.f32.vlgmr.msra.gmra.mxu2 %vm236_vm14, %v971_v53 }
 0x88a   :  { %v878_v37 = vpop.f32.mrf.mxu3 }
 0x88b   :  { %v879_v57 = vadd.f32 %v1669_v54, %v878_v37 }
 0x88d   :  { %936 = vst.msk [vmem:[#allocation2 + $0x8] sm:$0xff] %vm236_vm14, %v879_v57  ;;  %945 = vrot.lane.b32.xlu2 %v879_v57, %s1752_s26 }
 0x894   :  { %v972_v58 = vld [vmem:[#allocation2 + $0x8] sm:$0xff] }
 0x895   :  { %1624 = vmatmul.msk.f32.gmra.mxu2 %vm236_vm14, %v972_v58 }
 0x8e7   :  { %v946_v59 = vpop.permute.xlu2 %945 }
 0x8e8   :  { %950 = vst.msk [vmem:[#allocation2 + $0x18] sm:$0xff] %vm236_vm14, %v946_v59 }
 0x8ef   :  { %v974_v61 = vld [vmem:[#allocation2 + $0x18] sm:$0xff] }
 0x8f1   :  { %v944_v2 = vpop.permute.xlu1 %943 }
 0x8f2   :  { %949 = vst.msk [vmem:[#allocation2 + $0x10] sm:$0xff] %vm236_vm14, %v944_v2 }
 0x8f9   :  { %v973_v60 = vld [vmem:[#allocation2 + $0x10] sm:$0xff] }
 0x8fa   :  { %1627 = vmatmul.msk.f32.vlgmr.msra.gmra.mxu3 %vm236_vm14, %v973_v60 }
 0x902   :  { %1628 = vmatmul.msk.f32.gmra.mxu3 %vm236_vm14, %v974_v61 }
 0x90a   :  { %v1008_v62 = vpop.f32.mrf.mxu2 }
 0x90b   :  { %v1049_v63 = vmul.f32 0.25, %v1008_v62 }
 0x90d   :  { %v1053_v1 = vadd.f32 %v1049_v63, %v1912_v49 }
 0x90f   :  { %v1057_v3 = vsel %vm236_vm14, %v1053_v1, -inf }
 0x910   :  { %1058 = vmax.xlane.f32.xlu0 %v1057_v3  ;;  %v1633_v3 = vld [vmem:[%s2314_s3 + $0x120] sm:$0xff] }
 0x918   :  { %v1011_v4 = vpop.f32.mrf.mxu2 }
 0x919   :  { %v1050_v5 = vmul.f32 0.25, %v1011_v4 }
 0x91b   :  { %v1054_v6 = vadd.f32 %v1050_v5, %v1921_v0 }
 0x91d   :  { %v1060_v7 = vsel %vm236_vm14, %v1054_v6, -inf }
 0x91e   :  { %1061 = vmax.xlane.f32.xlu1 %v1060_v7 }
 0x97d   :  { %v1043_v8 = vpop.f32.mrf.mxu3 }
 0x97e   :  { %v1051_v9 = vmul.f32 0.25, %v1043_v8  ;;  %v1638_v8 = vld [vmem:[%s2314_s3 + $0x138] sm:$0xff] }
 0x97f   :  { %1271 = vmatpush.msrb.mxu3 %v1638_v8 }
 0x980   :  { %v1055_v11 = vadd.f32 %v1051_v9, %v1912_v49 }
 0x982   :  { %v1063_v14 = vsel %vm236_vm14, %v1055_v11, -inf }
 0x983   :  { %v1059_v15 = vpop.xlane.xlu0 %1058  ;;  %1064 = vmax.xlane.f32.xlu2 %v1063_v14 }
 0x984   :  { %v1069_v17 = vsub.f32 %v1053_v1, %v1059_v15 }
 0x985   :  { %v1046_v19 = vpop.f32.mrf.mxu3 }
 0x986   :  { %v1073_v13 = vmul.f32 1.442695, %v1069_v17  ;;  %v1052_v21 = vmul.f32 0.25, %v1046_v19 }
 0x988   :  { %1719 = vpow2.f32 %v1073_v13  ;;  %v1056_v23 = vadd.f32 %v1052_v21, %v1921_v0 }
 0x98a   :  { %v1066_v24 = vsel %vm236_vm14, %v1056_v23, -inf }
 0x98b   :  { %1067 = vmax.xlane.f32.xlu0 %v1066_v24 }
 0x98e   :  { %v1720_v25 = vpop.eup %1719 }
 0x98f   :  { %v1081_v27 = vsel %vm236_vm14, %v1720_v25, 0.0 }
 0x990   :  { %1082 = vadd.xlane.f32.xlu2 %v1081_v27 }
 0x991   :  { %v1062_v18 = vpop.xlane.xlu1 %1061 }
 0x992   :  { %v1070_v49 = vsub.f32 %v1054_v6, %v1062_v18 }
 0x994   :  { %v1075_v28 = vmul.f32 1.442695, %v1070_v49 }
 0x996   :  { %1721 = vpow2.f32 %v1075_v28 }
 0x99c   :  { %v1722_v29 = vpop.eup %1721 }
 0x99d   :  { %v1084_v30 = vsel %vm236_vm14, %v1722_v29, 0.0 }
 0x99e   :  { %1085 = vadd.xlane.f32.xlu0 %v1084_v30 }
 0x9b2   :  { %963 = vrot.lane.b32.xlu0 %v2091_v34, %s1752_s26 }
 0x9f6   :  { %v1065_v32 = vpop.xlane.xlu2 %1064 }
 0x9f7   :  { %v1071_v0 = vsub.f32 %v1055_v11, %v1065_v32 }
 0x9f9   :  { %v1077_v33 = vmul.f32 1.442695, %v1071_v0 }
 0x9fb   :  { %1723 = vpow2.f32 %v1077_v33 }
 0x9fe   :  { %v1068_v31 = vpop.xlane.xlu0 %1067 }
 0x9ff   :  { %v1072_v35 = vsub.f32 %v1056_v23, %v1068_v31 }
 0xa01   :  { %v2170_v36 = vpop.eup %1723  ;;  %v1079_v38 = vmul.f32 1.442695, %v1072_v35 }
 0xa02   :  { %v1087_v39 = vsel %vm236_vm14, %v2170_v36, 0.0 }
 0xa03   :  { %1725 = vpow2.f32 %v1079_v38  ;;  %1088 = vadd.xlane.f32.xlu1 %v1087_v39  ;;  %v1083_v40 = vpop.xlane.xlu2 %1082 }
 0xa04   :  { %1727 = vrcp.f32 %v1083_v40  ;;  %v1104_v47 = vand.u32 2147483648, %v1083_v40  ;;  %v1102_v26 = vand.u32 2147483647, %v1083_v40  ;;  %vm1098_vm13 = vweird.f32 %v1083_v40 }
 0xa06   :  { %v1105_v51 = vor.u32 1.1754944e-38, %v1104_v47  ;;  %vm1103_vm1 = vcmp.eq.f32.partialorder %v1102_v26, 8.507059e+37 }
 0xa09   :  { %v2174_v42 = vpop.eup %1725 }
 0xa0a   :  { %v1728_v44 = vpop.eup %1727  ;;  %v1090_v34 = vsel %vm236_vm14, %v2174_v42, 0.0 }
 0xa0b   :  { %v1094_v45 = vmul.f32 %v1728_v44, %v1083_v40  ;;  %1091 = vadd.xlane.f32.xlu2 %v1090_v34  ;;  %vm1099_vm12 = vweird.f32 %v1728_v44 }
 0xa0c   :  { %vm1100_vm15 = vmor %vm1098_vm13, %vm1099_vm12 }
 0xa0d   :  { %v1095_v46 = vsub.f32 1.0, %v1094_v45 }
 0xa0f   :  { %v1096_v16 = vmul.f32 %v1728_v44, %v1095_v46 }
 0xa11   :  { %v1097_v48 = vadd.f32 %v1728_v44, %v1096_v16  ;;  %v1086_v50 = vpop.xlane.xlu0 %1085 }
 0xa12   :  { %1729 = vrcp.f32 %v1086_v50  ;;  %v1119_v57 = vand.u32 2147483648, %v1086_v50  ;;  %v1117_v59 = vand.u32 2147483647, %v1086_v50  ;;  %vm1113_vm3 = vweird.f32 %v1086_v50 }
 0xa13   :  { %v1101_v52 = vsel %vm1100_vm15, %v1728_v44, %v1097_v48 }
 0xa14   :  { %v1106_v54 = vsel %vm1103_vm1, %v1105_v51, %v1101_v52  ;;  %v1120_v60 = vor.u32 1.1754944e-38, %v1119_v57  ;;  %vm1118_vm5 = vcmp.eq.f32.partialorder %v1117_v59, 8.507059e+37 }
 0xa15   :  { %v1107_v55 = vmul.f32 %v1720_v25, %v1106_v54 }
 0xa17   :  { %1629 = vmatmul.msk.f32.vlgmr.msra.gmra.mxu0 %vm236_vm14, %v1107_v55 }
 0xa18   :  { %v1730_v56 = vpop.eup %1729 }
 0xa19   :  { %v1109_v53 = vmul.f32 %v1730_v56, %v1086_v50  ;;  %vm1114_vm2 = vweird.f32 %v1730_v56 }
 0xa1a   :  { %vm1115_vm4 = vmor %vm1113_vm3, %vm1114_vm2 }
 0xa1b   :  { %v1110_v37 = vsub.f32 1.0, %v1109_v53 }
 0xa1c   :  { %965 = vrot.lane.b32.xlu1 %v2103_v43, %s1752_s26  ;;  %v1634_v43 = vld [vmem:[%s2314_s3 + $0x128] sm:$0xff] }
 0xa1d   :  { %v1111_v58 = vmul.f32 %v1730_v56, %v1110_v37  ;;  %1237 = vmatpush.msrb.mxu2 %v1634_v43  ;;  %v1597_v43 = vld [vmem:[%s2314_s3 + $0x140] sm:$0xff] }
 0xa1f   :  { %v1112_v2 = vadd.f32 %v1730_v56, %v1111_v58  ;;  %1238 = vmatpush.msrb.mxu2 %v1633_v3 }
 0xa21   :  { %v1116_v61 = vsel %vm1115_vm4, %v1730_v56, %v1112_v2 }
 0xa22   :  { %v1121_v62 = vsel %vm1118_vm5, %v1120_v60, %v1116_v61 }
 0xa23   :  { %v1122_v63 = vmul.f32 %v1722_v29, %v1121_v62  ;;  %v1600_v62 = vld [vmem:[%s2314_s3 + $0x158] sm:$0xff] }
 0xa24   :  { %v964_v1 = vpop.permute.xlu0 %963  ;;  %1385 = vmatpush.msrb.mxu0 %v1600_v62  ;;  %v1602_v62 = vld [vmem:[%s2314_s3 + $0x168] sm:$0xff] }
 0xa25   :  { %969 = vst.msk [vmem:[#allocation4 + $0x10] sm:$0xff] %vm236_vm14, %v964_v1  ;;  %1630 = vmatmul.msk.f32.gmra.mxu0 %vm236_vm14, %v1122_v63  ;;  %v1599_v63 = vld [vmem:[%s2314_s3 + $0x150] sm:$0xff]  ;;  %v1598_v1 = vld [vmem:[%s2314_s3 + $0x148] sm:$0xff] }
 0xa26   :  { %1386 = vmatpush.msrb.mxu0 %v1599_v63  ;;  %v1601_v63 = vld [vmem:[%s2314_s3 + $0x160] sm:$0xff] }
 0xa28   :  { %1387 = vmatpush.msrb.mxu0 %v1598_v1 }
 0xa2a   :  { %1388 = vmatpush.msrb.mxu0 %v1597_v43 }
 0xa2c   :  { %v1155_v32 = vld [vmem:[#allocation4 + $0x10] sm:$0xff] }
 0xa76   :  { %v1089_v4 = vpop.xlane.xlu1 %1088 }
 0xa77   :  { %1731 = vrcp.f32 %v1089_v4  ;;  %v1134_v21 = vand.u32 2147483648, %v1089_v4  ;;  %vm1128_vm7 = vweird.f32 %v1089_v4  ;;  %v1132_v23 = vand.u32 2147483647, %v1089_v4 }
 0xa79   :  { %v1135_v27 = vor.u32 1.1754944e-38, %v1134_v21  ;;  %vm1133_vm9 = vcmp.eq.f32.partialorder %v1132_v23, 8.507059e+37 }
 0xa7d   :  { %v1732_v6 = vpop.eup %1731 }
 0xa7e   :  { %v1092_v5 = vpop.xlane.xlu2 %1091  ;;  %v1124_v7 = vmul.f32 %v1732_v6, %v1089_v4  ;;  %vm1129_vm6 = vweird.f32 %v1732_v6 }
 0xa7f   :  { %1733 = vrcp.f32 %v1092_v5  ;;  %vm1130_vm8 = vmor %vm1128_vm7, %vm1129_vm6  ;;  %v1149_v30 = vand.u32 2147483648, %v1092_v5  ;;  %vm1143_vm11 = vweird.f32 %v1092_v5  ;;  %v1147_v33 = vand.u32 2147483647, %v1092_v5 }
 0xa80   :  { %v1125_v9 = vsub.f32 1.0, %v1124_v7 }
 0xa81   :  { %v1150_v35 = vor.u32 1.1754944e-38, %v1149_v30  ;;  %vm1148_vm13 = vcmp.eq.f32.partialorder %v1147_v33, 8.507059e+37 }
 0xa82   :  { %v1126_v14 = vmul.f32 %v1732_v6, %v1125_v9 }
 0xa84   :  { %v1127_v17 = vadd.f32 %v1732_v6, %v1126_v14 }
 0xa85   :  { %v1734_v11 = vpop.eup %1733 }
 0xa86   :  { %v1139_v15 = vmul.f32 %v1734_v11, %v1092_v5  ;;  %v1131_v24 = vsel %vm1130_vm8, %v1732_v6, %v1127_v17  ;;  %vm1144_vm10 = vweird.f32 %v1734_v11 }
 0xa87   :  { %v1136_v49 = vsel %vm1133_vm9, %v1135_v27, %v1131_v24  ;;  %vm1145_vm12 = vmor %vm1143_vm11, %vm1144_vm10 }
 0xa88   :  { %v1140_v19 = vsub.f32 1.0, %v1139_v15  ;;  %v1137_v0 = vmul.f32 %v2170_v36, %v1136_v49  ;;  %v1637_v36 = vld [vmem:[%s2314_s3 + $0x130] sm:$0xff] }
 0xa89   :  { %1272 = vmatpush.msrb.mxu3 %v1637_v36 }
 0xa8a   :  { %v1141_v25 = vmul.f32 %v1734_v11, %v1140_v19 }
 0xa8c   :  { %v1142_v29 = vadd.f32 %v1734_v11, %v1141_v25 }
 0xa8e   :  { %v966_v13 = vpop.permute.xlu1 %965  ;;  %v1146_v31 = vsel %vm1145_vm12, %v1734_v11, %v1142_v29 }
 0xa8f   :  { %970 = vst.msk [vmem:[#allocation4 + $0x18] sm:$0xff] %vm236_vm14, %v966_v13  ;;  %v1151_v38 = vsel %vm1148_vm13, %v1150_v35, %v1146_v31 }
 0xa90   :  { %v1152_v39 = vmul.f32 %v2174_v42, %v1151_v38  ;;  %v1670_v42 = vld [vmem:[%s2313_s4 + $0x15] ss:$0 sm:$0xff] }
 0xa94   :  { %v1180_v18 = vpop.f32.mrf.mxu0 }
 0xa95   :  { %1635 = vmatmul.msk.f32.vlgmr.msrb.gmra.mxu2 %vm236_vm14, %v1180_v18 }
 0xa96   :  { %v1156_v28 = vld [vmem:[#allocation4 + $0x18] sm:$0xff] }
 0xa97   :  { %1206 = vmatpush.msra.mxu1 %v1156_v28  ;;  %v1604_v28 = vld [vmem:[%s2314_s3 + $0x178] sm:$0xff] }
 0xa99   :  { %1207 = vmatpush.msra.mxu1 %v1155_v32 }
 0xa9a   :  { %1631 = vmatmul.msk.f32.vlgmr.msra.gmra.mxu1 %vm236_vm14, %v1137_v0 }
 0xa9b   :  { %1417 = vmatpush.msrb.mxu1 %v1604_v28 }
 0xaa2   :  { %v1183_v40 = vpop.f32.mrf.mxu0  ;;  %1632 = vmatmul.msk.f32.gmra.mxu1 %vm236_vm14, %v1152_v39 }
 0xaa3   :  { %1636 = vmatmul.msk.f32.gmra.mxu2 %vm236_vm14, %v1183_v40 }
 0xb17   :  { %v1209_v44 = vpop.f32.mrf.mxu1 }
 0xb18   :  { %1639 = vmatmul.msk.f32.vlgmr.msrb.gmra.mxu3 %vm236_vm14, %v1209_v44  ;;  %v1240_v45 = vpop.f32.mrf.mxu2 }
 0xb19   :  { %v1247_v46 = vadd.f32 %v1670_v42, %v1240_v45 }
 0xb1f   :  { %v1212_v34 = vpop.f32.mrf.mxu1 }
 0xb20   :  { %1640 = vmatmul.msk.f32.gmra.mxu3 %vm236_vm14, %v1212_v34 }
 0xb26   :  { %v1243_v48 = vpop.f32.mrf.mxu2 }
 0xb27   :  { %v1248_v51 = vadd.f32 %v1670_v42, %v1243_v48 }
 0xb9b   :  { %v1274_v47 = vpop.f32.mrf.mxu3 }
 0xb9c   :  { %v1280_v16 = vadd.f32 %v1274_v47, %v1247_v46  ;;  %v1671_v47 = vld [vmem:[%s2313_s4 + $0x16] ss:$0 sm:$0xff] }
 0xb9e   :  { %v1282_v26 = vadd.f32 %v1280_v16, %v2136_v41 }
 0xba0   :  { %v1284_v50 = vsel %vm62_vm0, %v1282_v26, 0.0 }
 0xba1   :  { %1285 = vadd.xlane.f32.xlu2 %v1284_v50  ;;  %v1672_v50 = vld [vmem:[%s2313_s4 + $0x17] ss:$0 sm:$0xff] }
 0xba3   :  { %v1277_v52 = vpop.f32.mrf.mxu3 }
 0xba4   :  { %v1281_v54 = vadd.f32 %v1277_v52, %v1248_v51 }
 0xba6   :  { %v1283_v55 = vadd.f32 %v1281_v54, %v2141_v22 }
 0xba8   :  { %v1287_v56 = vsel %vm62_vm0, %v1283_v55, 0.0 }
 0xba9   :  { %1288 = vadd.xlane.f32.xlu2 %v1287_v56 }
 0xc14   :  { %v1286_v53 = vpop.xlane.xlu2 %1285 }
 0xc15   :  { %v1290_v37 = vmul.f32 %v1286_v53, %v1807_v10 }
 0xc17   :  { %v2212_v57 = vsub.f32 %v1282_v26, %v1290_v37 }
 0xc19   :  { %v1294_v41 = vmul.f32 %v2212_v57, %v2212_v57 }
 0xc1b   :  { %v1296_v58 = vsel %vm62_vm0, %v1294_v41, 0.0 }
 0xc1c   :  { %1297 = vadd.xlane.f32.xlu2 %v1296_v58  ;;  %v1289_v59 = vpop.xlane.xlu2 %1288 }
 0xc1d   :  { %v1291_v2 = vmul.f32 %v1289_v59, %v1807_v10 }
 0xc1f   :  { %v2218_v60 = vsub.f32 %v1283_v55, %v1291_v2 }
 0xc21   :  { %v1295_v22 = vmul.f32 %v2218_v60, %v2218_v60 }
 0xc23   :  { %v1299_v61 = vsel %vm62_vm0, %v1295_v22, 0.0 }
 0xc24   :  { %1300 = vadd.xlane.f32.xlu0 %v1299_v61  ;;  %v1603_v61 = vld [vmem:[%s2314_s3 + $0x170] sm:$0xff] }
 0xc25   :  { %1418 = vmatpush.msrb.mxu1 %v1603_v61 }
 0xc27   :  { %1419 = vmatpush.msrb.mxu1 %v1602_v62 }
 0xc29   :  { %1420 = vmatpush.msrb.mxu1 %v1601_v63 }
 0xc8f   :  { %v1298_v3 = vpop.xlane.xlu2 %1297 }
 0xc90   :  { %v1302_v4 = vmul.f32 %v1298_v3, %v1807_v10 }
 0xc92   :  { %v1304_v5 = vadd.f32 1e-08, %v1302_v4 }
 0xc94   :  { %1735 = vrsqrt.f32 %v1304_v5  ;;  %vm1313_vm14 = vcmp.eq.f32.partialorder %v1304_v5, inf  ;;  %v1316_v25 = vand.u32 2147483648, %v1304_v5  ;;  %vm1315_vm15 = vcmp.eq.f32.partialorder %v1304_v5, 0.0 }
 0xc97   :  { %v1301_v6 = vpop.xlane.xlu0 %1300 }
 0xc98   :  { %v1303_v7 = vmul.f32 %v1301_v6, %v1807_v10 }
 0xc9a   :  { %v1736_v8 = vpop.eup %1735  ;;  %v1305_v9 = vadd.f32 1e-08, %v1303_v7  ;;  %v1674_v7 = vld [vmem:[%s2313_s4 + $0x19] ss:$0 sm:$0xff] }
 0xc9b   :  { %v1307_v11 = vmul.f32 %v1736_v8, %v1304_v5 }
 0xc9c   :  { %1737 = vrsqrt.f32 %v1305_v9  ;;  %vm1325_vm1 = vcmp.eq.f32.partialorder %v1305_v9, inf  ;;  %v1328_v0 = vand.u32 2147483648, %v1305_v9  ;;  %vm1327_vm2 = vcmp.eq.f32.partialorder %v1305_v9, 0.0 }
 0xc9d   :  { %v1308_v14 = vmul.f32 %v1736_v8, %v1307_v11 }
 0xc9f   :  { %v1309_v15 = vmul.f32 0.5, %v1308_v14 }
 0xca1   :  { %v1310_v17 = vsub.f32 1.5, %v1309_v15 }
 0xca2   :  { %v1738_v19 = vpop.eup %1737 }
 0xca3   :  { %v1311_v13 = vmul.f32 %v1736_v8, %v1310_v17  ;;  %v1319_v21 = vmul.f32 %v1738_v19, %v1305_v9 }
 0xca5   :  { %v1312_v23 = vmul.f32 %v1311_v13, %v1304_v5  ;;  %v1320_v24 = vmul.f32 %v1738_v19, %v1319_v21 }
 0xca7   :  { %v1314_v27 = vsel %vm1313_vm14, %v1304_v5, %v1312_v23  ;;  %v1321_v18 = vmul.f32 0.5, %v1320_v24 }
 0xca8   :  { %v1317_v49 = vsel %vm1315_vm15, %v1316_v25, %v1314_v27 }
 0xca9   :  { %v1322_v29 = vsub.f32 1.5, %v1321_v18  ;;  %1739 = vrcp.f32 %v1317_v49  ;;  %v1341_v40 = vand.u32 2147483648, %v1317_v49  ;;  %v1339_v44 = vand.u32 2147483647, %v1317_v49 }
 0xcaa   :  { %vm1335_vm4 = vweird.f32 %v1317_v49 }
 0xcab   :  { %v1323_v30 = vmul.f32 %v1738_v19, %v1322_v29  ;;  %v1342_v45 = vor.u32 1.1754944e-38, %v1341_v40  ;;  %vm1340_vm6 = vcmp.eq.f32.partialorder %v1339_v44, 8.507059e+37 }
 0xcad   :  { %v1324_v32 = vmul.f32 %v1323_v30, %v1305_v9 }
 0xcaf   :  { %v1740_v33 = vpop.eup %1739  ;;  %v1326_v31 = vsel %vm1325_vm1, %v1305_v9, %v1324_v32 }
 0xcb0   :  { %v1331_v35 = vmul.f32 %v1740_v33, %v1317_v49  ;;  %v1329_v38 = vsel %vm1327_vm2, %v1328_v0, %v1326_v31  ;;  %vm1336_vm3 = vweird.f32 %v1740_v33 }
 0xcb1   :  { %1741 = vrcp.f32 %v1329_v38  ;;  %vm1337_vm5 = vmor %vm1335_vm4, %vm1336_vm3  ;;  %v1356_v52 = vand.u32 2147483648, %v1329_v38  ;;  %v1354_v56 = vand.u32 2147483647, %v1329_v38  ;;  %vm1350_vm8 = vweird.f32 %v1329_v38 }
 0xcb2   :  { %v1332_v39 = vsub.f32 1.0, %v1331_v35 }
 0xcb3   :  { %v1357_v41 = vor.u32 1.1754944e-38, %v1356_v52  ;;  %vm1355_vm10 = vcmp.eq.f32.partialorder %v1354_v56, 8.507059e+37 }
 0xcb4   :  { %v1333_v36 = vmul.f32 %v1740_v33, %v1332_v39 }
 0xcb6   :  { %v1334_v34 = vadd.f32 %v1740_v33, %v1333_v36 }
 0xcb7   :  { %v1742_v42 = vpop.eup %1741 }
 0xcb8   :  { %v1338_v46 = vsel %vm1337_vm5, %v1740_v33, %v1334_v34  ;;  %v1346_v16 = vmul.f32 %v1742_v42, %v1329_v38  ;;  %vm1351_vm7 = vweird.f32 %v1742_v42 }
 0xcb9   :  { %v1343_v26 = vsel %vm1340_vm6, %v1342_v45, %v1338_v46  ;;  %vm1352_vm9 = vmor %vm1350_vm8, %vm1351_vm7  ;;  %vm1545_vm8 = vcmask 130112  }
 0xcba   :  { %v1344_v48 = vmul.f32 %v1343_v26, %v2212_v57  ;;  %v1347_v51 = vsub.f32 1.0, %v1346_v16 }
 0xcbc   :  { %v1361_v54 = vmul.f32 %v1671_v47, %v1344_v48  ;;  %v1348_v55 = vmul.f32 %v1742_v42, %v1347_v51 }
 0xcbe   :  { %v1364_v53 = vadd.f32 %v1672_v50, %v1361_v54  ;;  %v1349_v37 = vadd.f32 %v1742_v42, %v1348_v55 }
 0xcc0   :  { %1641 = vmatmul.msk.f32.vlgmr.msrb.gmra.mxu0 %vm62_vm0, %v1364_v53  ;;  %v1353_v58 = vsel %vm1352_vm9, %v1742_v42, %v1349_v37  ;;  %vm1550_vm9 = vcmask 1041409  }
 0xcc1   :  { %v1358_v57 = vsel %vm1355_vm10, %v1357_v41, %v1353_v58  ;;  %vm1553_vm10 = vcmask 123904  }
 0xcc2   :  { %v1359_v59 = vmul.f32 %v1358_v57, %v2218_v60  ;;  %v1673_v60 = vld [vmem:[%s2313_s4 + $0x18] ss:$0 sm:$0xff] }
 0xcc4   :  { %v1362_v2 = vmul.f32 %v1671_v47, %v1359_v59 }
 0xcc6   :  { %v1365_v22 = vadd.f32 %v1672_v50, %v1362_v2 }
 0xcc8   :  { %1642 = vmatmul.msk.f32.gmra.mxu0 %vm62_vm0, %v1365_v22 }
 0xd3d   :  { %v1390_v1 = vpop.f32.mrf.mxu0 }
 0xd3e   :  { %v1391_v43 = vadd.f32 %v1673_v60, %v1390_v1 }
 0xd40   :  { %v1396_v3 = vmax.f32 %v1391_v43, 0.0 }
 0xd42   :  { %1643 = vmatmul.msk.f32.vlgmr.msrb.gmra.mxu1 %vm62_vm0, %v1396_v3 }
 0xd45   :  { %v1393_v4 = vpop.f32.mrf.mxu0 }
 0xd46   :  { %v1394_v5 = vadd.f32 %v1673_v60, %v1393_v4  ;;  %v1675_v60 = vld [vmem:[%s2317_s5] ss:$0 sm:$0xff]  ;;  %v1676_v4 = vld [vmem:[%s2317_s5 + $0x1] ss:$0 sm:$0xff] }
 0xd48   :  { %v1397_v6 = vmax.f32 %v1394_v5, 0.0 }
 0xd4a   :  { %1644 = vmatmul.msk.f32.gmra.mxu1 %vm62_vm0, %v1397_v6 }
 0xdbf   :  { %v1422_v8 = vpop.f32.mrf.mxu1 }
 0xdc0   :  { %v1423_v9 = vadd.f32 %v1674_v7, %v1422_v8 }
 0xdc2   :  { %v1428_v11 = vadd.f32 %v1423_v9, %v1364_v53 }
 0xdc4   :  { %v1430_v14 = vmul.f32 %v1428_v11, %v2064_v12  ;;  %v1518_v11 = vld [vmem:[%s2318_s6 + $0x10] sm:$0xff] }
 0xdc6   :  { %v1434_v15 = vsel %vm62_vm0, %v1430_v14, 0.0 }
 0xdc7   :  { %v1425_v17 = vpop.f32.mrf.mxu1  ;;  %1435 = vadd.xlane.f32.xlu1 %v1434_v15 }
 0xdc8   :  { %v1426_v19 = vadd.f32 %v1674_v7, %v1425_v17 }
 0xdca   :  { %v1429_v13 = vadd.f32 %v1426_v19, %v1365_v22 }
 0xdcc   :  { %v1431_v21 = vmul.f32 %v1429_v13, %v2073_v20 }
 0xdce   :  { %v1437_v23 = vsel %vm62_vm0, %v1431_v21, 0.0 }
 0xdcf   :  { %1438 = vadd.xlane.f32.xlu2 %v1437_v23 }
 0xe3a   :  { %v1436_v24 = vpop.xlane.xlu1 %1435 }
 0xe3b   :  { %v1440_v25 = vmul.f32 %v1436_v24, %v1807_v10 }
 0xe3d   :  { %v2272_v27 = vsub.f32 %v1430_v14, %v1440_v25  ;;  %v1516_v14 = vld [vmem:[%s2318_s6] sm:$0xff] }
 0xe3f   :  { %v1444_v18 = vmul.f32 %v2272_v27, %v2272_v27 }
 0xe41   :  { %v1446_v12 = vsel %vm62_vm0, %v1444_v18, 0.0 }
 0xe42   :  { %v1439_v49 = vpop.xlane.xlu2 %1438  ;;  %1447 = vadd.xlane.f32.xlu2 %v1446_v12 }
 0xe43   :  { %v1441_v28 = vmul.f32 %v1439_v49, %v1807_v10  ;;  %v1517_v49 = vld [vmem:[%s2318_s6 + $0x8] sm:$0xff] }
 0xe45   :  { %v2278_v29 = vsub.f32 %v1431_v21, %v1441_v28 }
 0xe47   :  { %v1445_v20 = vmul.f32 %v2278_v29, %v2278_v29 }
 0xe49   :  { %v1449_v30 = vsel %vm62_vm0, %v1445_v20, 0.0 }
 0xe4a   :  { %1450 = vadd.xlane.f32.xlu2 %v1449_v30 }
 0xeb5   :  { %v1448_v32 = vpop.xlane.xlu2 %1447 }
 0xeb6   :  { %v1452_v0 = vmul.f32 %v1448_v32, %v1807_v10  ;;  %v1519_v32 = vld [vmem:[%s2318_s6 + $0x18] sm:$0xff] }
 0xeb8   :  { %v1454_v33 = vadd.f32 1e-08, %v1452_v0 }
 0xeba   :  { %1743 = vrsqrt.f32 %v1454_v33  ;;  %vm1463_vm11 = vcmp.eq.f32.partialorder %v1454_v33, inf  ;;  %v1466_v26 = vand.u32 2147483648, %v1454_v33  ;;  %vm1465_vm12 = vcmp.eq.f32.partialorder %v1454_v33, 0.0 }
 0xebd   :  { %v1451_v31 = vpop.xlane.xlu2 %1450 }
 0xebe   :  { %v1453_v35 = vmul.f32 %v1451_v31, %v1807_v10  ;;  %v1540_v31 = vlaneseq }
 0xec0   :  { %v1744_v38 = vpop.eup %1743  ;;  %v1455_v39 = vadd.f32 1e-08, %v1453_v35 }
 0xec1   :  { %v1457_v40 = vmul.f32 %v1744_v38, %v1454_v33 }
 0xec2   :  { %1745 = vrsqrt.f32 %v1455_v39  ;;  %vm1475_vm13 = vcmp.eq.f32.partialorder %v1455_v39, inf  ;;  %v1478_v55 = vand.u32 2147483648, %v1455_v39  ;;  %vm1477_vm14 = vcmp.eq.f32.partialorder %v1455_v39, 0.0 }
 0xec3   :  { %v1458_v36 = vmul.f32 %v1744_v38, %v1457_v40 }
 0xec5   :  { %v1459_v44 = vmul.f32 0.5, %v1458_v36 }
 0xec7   :  { %v1460_v34 = vsub.f32 1.5, %v1459_v44 }
 0xec8   :  { %v1746_v42 = vpop.eup %1745 }
 0xec9   :  { %v1469_v45 = vmul.f32 %v1746_v42, %v1455_v39  ;;  %v1461_v46 = vmul.f32 %v1744_v38, %v1460_v34  ;;  %v1541_v38 = vand.u32 127, %v1540_v31 }
 0xecb   :  { %v1470_v47 = vmul.f32 %v1746_v42, %v1469_v45  ;;  %v1462_v16 = vmul.f32 %v1461_v46, %v1454_v33 }
 0xecd   :  { %v1471_v48 = vmul.f32 0.5, %v1470_v47  ;;  %v1464_v50 = vsel %vm1463_vm11, %v1454_v33, %v1462_v16 }
 0xece   :  { %v1467_v51 = vsel %vm1465_vm12, %v1466_v26, %v1464_v50 }
 0xecf   :  { %v1472_v52 = vsub.f32 1.5, %v1471_v48  ;;  %1747 = vrcp.f32 %v1467_v51  ;;  %v1491_v57 = vand.u32 2147483648, %v1467_v51  ;;  %v1489_v2 = vand.u32 2147483647, %v1467_v51 }
 0xed0   :  { %vm1485_vm1 = vweird.f32 %v1467_v51 }
 0xed1   :  { %v1473_v10 = vmul.f32 %v1746_v42, %v1472_v52  ;;  %v1492_v62 = vor.u32 1.1754944e-38, %v1491_v57  ;;  %vm1490_vm3 = vcmp.eq.f32.partialorder %v1489_v2, 8.507059e+37 }
 0xed3   :  { %v1474_v54 = vmul.f32 %v1473_v10, %v1455_v39 }
 0xed5   :  { %v1748_v56 = vpop.eup %1747  ;;  %v1476_v53 = vsel %vm1475_vm13, %v1455_v39, %v1474_v54  ;;  %v1543_v39 = vadd.s32 4294967288, %v1541_v38 }
 0xed6   :  { %v1481_v37 = vmul.f32 %v1748_v56, %v1467_v51  ;;  %v1479_v41 = vsel %vm1477_vm14, %v1478_v55, %v1476_v53  ;;  %vm1486_vm15 = vweird.f32 %v1748_v56 }
 0xed7   :  { %1749 = vrcp.f32 %v1479_v41  ;;  %vm1487_vm2 = vmor %vm1485_vm1, %vm1486_vm15  ;;  %v1506_v6 = vand.u32 2147483648, %v1479_v41  ;;  %v1504_v9 = vand.u32 2147483647, %v1479_v41  ;;  %vm1500_vm5 = vweird.f32 %v1479_v41 }
 0xed8   :  { %v1482_v58 = vsub.f32 1.0, %v1481_v37 }
 0xed9   :  { %v1507_v19 = vor.u32 1.1754944e-38, %v1506_v6  ;;  %vm1505_vm7 = vcmp.eq.f32.partialorder %v1504_v9, 8.507059e+37 }
 0xeda   :  { %v1483_v59 = vmul.f32 %v1748_v56, %v1482_v58 }
 0xedc   :  { %v1484_v22 = vadd.f32 %v1748_v56, %v1483_v59 }
 0xedd   :  { %v1750_v61 = vpop.eup %1749 }
 0xede   :  { %v1488_v63 = vsel %vm1487_vm2, %v1748_v56, %v1484_v22  ;;  %v1496_v1 = vmul.f32 %v1750_v61, %v1479_v41  ;;  %vm1501_vm4 = vweird.f32 %v1750_v61 }
 0xedf   :  { %v1493_v43 = vsel %vm1490_vm3, %v1492_v62, %v1488_v63  ;;  %vm1502_vm6 = vmor %vm1500_vm5, %vm1501_vm4 }
 0xee0   :  { %v1494_v3 = vmul.f32 %v1493_v43, %v2272_v27  ;;  %v1497_v5 = vsub.f32 1.0, %v1496_v1 }
 0xee2   :  { %v1511_v7 = vmul.f32 %v1675_v60, %v1494_v3  ;;  %v1498_v8 = vmul.f32 %v1750_v61, %v1497_v5 }
 0xee4   :  { %v1514_v15 = vadd.f32 %v1676_v4, %v1511_v7  ;;  %v1499_v17 = vadd.f32 %v1750_v61, %v1498_v8 }
 0xee6   :  { %v1522_v13 = vmul.f32 %v1518_v11, %v1514_v15  ;;  %v1520_v21 = vmul.f32 %v1516_v14, %v1514_v15  ;;  %v1503_v23 = vsel %vm1502_vm6, %v1750_v61, %v1499_v17 }
 0xee7   :  { %v1508_v24 = vsel %vm1505_vm7, %v1507_v19, %v1503_v23 }
 0xee8   :  { %v1530_v25 = vsel %vm62_vm0, %v1522_v13, 0.0  ;;  %v1524_v27 = vsel %vm62_vm0, %v1520_v21, 0.0  ;;  %v1509_v18 = vmul.f32 %v1508_v24, %v2278_v29 }
 0xee9   :  { %1531 = vadd.xlane.f32.xlu0 %v1530_v25  ;;  %1525 = vadd.xlane.f32.xlu2 %v1524_v27 }
 0xeea   :  { %v1512_v12 = vmul.f32 %v1675_v60, %v1509_v18 }
 0xeec   :  { %v1515_v28 = vadd.f32 %v1676_v4, %v1512_v12 }
 0xeee   :  { %v1521_v20 = vmul.f32 %v1517_v49, %v1515_v28  ;;  %v1523_v0 = vmul.f32 %v1519_v32, %v1515_v28 }
 0xef0   :  { %v1527_v30 = vsel %vm62_vm0, %v1521_v20, 0.0  ;;  %v1533_v33 = vsel %vm62_vm0, %v1523_v0, 0.0 }
 0xef1   :  { %1528 = vadd.xlane.f32.xlu2 %v1527_v30 }
 0xef9   :  { %1534 = vadd.xlane.f32.xlu2 %v1533_v33 }
 0xf5c   :  { %v1526_v29 = vpop.xlane.xlu2 %1525  ;;  %v1532_v40 = vpop.xlane.xlu0 %1531 }
 0xf5d   :  { %v1547_v34 = vperm.slane %v1532_v40, %v1541_v38  ;;  %v1542_v42 = vperm.slane %v1526_v29, %v1541_v38 }
 0xf64   :  { %v1529_v35 = vpop.xlane.xlu2 %1528 }
 0xf65   :  { %v1544_v36 = vperm.slane %v1529_v35, %v1543_v39 }
 0xf67   :  { %v1546_v46 = vsel %vm1545_vm8, %v1544_v36, %v1542_v42 }
 0xf6c   :  { %v1535_v44 = vpop.xlane.xlu2 %1534 }
 0xf6d   :  { %v1548_v45 = vperm.slane %v1535_v44, %v1543_v39 }
 0xf6f   :  { %v1549_v47 = vsel %vm1545_vm8, %v1548_v45, %v1547_v34 }
 0xf70   :  { %v1551_v16 = vsel %vm1550_vm9, %v1549_v47, %v1546_v46 }
 0xf71   :  { %1554 = vst.msk [vmem:[%s2319_s7] sm:$0x3] %vm1553_vm10, %v1551_v16 }

</bundles_post_ra>
